<compile_context>
chip_gen: v7x
topology: tpu7x:2x2x1
jax: 0.10.0
libtpu: 0.0.40
codegen_flags: <defaults>
</compile_context>

<pallas_src>
import jax
import jax.numpy as jnp
from jax import lax
from jax.experimental import pallas as pl
from jax.experimental.pallas import tpu as pltpu

# ---------------------------------------------------------------------------
# Problem sizes (small, consistent with a 2x4x16x16 NCHW input)
# ---------------------------------------------------------------------------
B, CIN, H, W = 2, 4, 16, 16
KH = KW = 3
COUT = 32          # conv output channels == BN channels
EMB = 32           # embedding dim
HW = H * W
K = CIN * KH * KW  # im2col patch length
BN_EPS = 1e-5


# ---------------------------------------------------------------------------
# Single fused kernel: conv + BN-features + BN/ReLU + pool + emb + regressor
# ---------------------------------------------------------------------------
def qe_fused_kernel(patch_ref, w_conv_ref, b_conv_ref, scale_ref, shift_ref,
                    w_emb_ref, b_emb_ref, w_reg_ref, b_reg_ref,
                    emb_ref, qual_ref):
    # patch_ref: (B*HW, K) -- one matmul for the whole batch.
    conv = jnp.dot(patch_ref[...], w_conv_ref[...],
                   preferred_element_type=jnp.float32) + b_conv_ref[...]   # (B*HW, COUT)

    # Per-sample per-channel statistics of the BN-layer input ("running values").
    conv3 = conv.reshape(B, HW, COUT)
    mean = jnp.mean(conv3, axis=1)                                         # (B, COUT)
    var = jnp.maximum(jnp.mean(conv3 * conv3, axis=1) - mean * mean, 0.0)  # (B, COUT)

    # BatchNorm (inference; running stats pre-folded into scale/shift) + ReLU.
    act = jnp.maximum(conv * scale_ref[...] + shift_ref[...], 0.0)         # (B*HW, COUT)

    # Global average pool + embedding head.
    pooled = jnp.mean(act.reshape(B, HW, COUT), axis=1)                    # (B, COUT)
    emb_ref[...] = (jnp.dot(pooled, w_emb_ref[...],
                            preferred_element_type=jnp.float32)
                    + b_emb_ref[...])                                      # (B, EMB)

    # TODO(synk): CatBoostRegressor replaced by a linear head over BN features.
    wr = w_reg_ref[...]                                                    # (2, COUT)
    qual_ref[...] = (jnp.sum(mean * wr[0:1, :] + var * wr[1:2, :],
                             axis=-1, keepdims=True)
                     + b_reg_ref[0])                                       # (B, 1)


def qe_fused(patches2d, w_conv, b_conv, scale, shift, w_emb, b_emb, w_reg, b_reg):
    vmem = pl.BlockSpec(memory_space=pltpu.MemorySpace.VMEM)
    smem = pl.BlockSpec(memory_space=pltpu.MemorySpace.SMEM)
    return pl.pallas_call(
        qe_fused_kernel,
        out_shape=(
            jax.ShapeDtypeStruct((B, EMB), jnp.float32),
            jax.ShapeDtypeStruct((B, 1), jnp.float32),
        ),
        # No grid: whole problem is one step; all operands live in VMEM
        # (scalar regressor bias in SMEM).  Total footprint ~170 KB.
        in_specs=[vmem, vmem, vmem, vmem, vmem, vmem, vmem, vmem, smem],
        out_specs=(vmem, vmem),
    )(patches2d, w_conv, b_conv, scale, shift, w_emb, b_emb, w_reg, b_reg)


# ---------------------------------------------------------------------------
# Pipeline wrapper (im2col + BN folding in plain JAX, hot path in Pallas)
# ---------------------------------------------------------------------------
def quality_estimator_forward(x_nchw, params, return_emb=False):
    # NCHW -> NHWC (8 KB, cheap) so patches come out channel-last and the
    # flatten to (B*HW, K) is a pure reshape (no HBM relayout of patches).
    x_nhwc = jnp.transpose(x_nchw, (0, 2, 3, 1)).astype(jnp.float32)
    patches = lax.conv_general_dilated_patches(
        x_nhwc, filter_shape=(KH, KW), window_strides=(1, 1), padding="SAME",
        dimension_numbers=("NHWC", "HWIO", "NHWC"))                 # (B, H, W, K)
    patches2d = patches.reshape(B * HW, K)

    # Fold BN running stats into per-channel scale/shift: y = conv*scale + shift.
    inv_std = lax.rsqrt(params["bn_rvar"] + BN_EPS)
    scale = params["bn_gamma"] * inv_std
    shift = params["bn_beta"] - params["bn_rmean"] * scale

    emb, qual = qe_fused(patches2d, params["w_conv"], params["b_conv"],
                         scale, shift, params["w_emb"], params["b_emb"],
                         params["w_reg"], params["b_reg"])

    quality = qual.reshape(B)   # matches torch.Tensor(regressor.predict(...)) -> (B,)
    if return_emb:
        return emb, quality
    return quality


def init_params(key):
    ks = jax.random.split(key, 8)
    return {
        "w_conv": 0.1 * jax.random.normal(ks[0], (K, COUT), jnp.float32),
        "b_conv": 0.1 * jax.random.normal(ks[1], (1, COUT), jnp.float32),
        "bn_gamma": jnp.ones((1, COUT), jnp.float32),
        "bn_beta": jnp.zeros((1, COUT), jnp.float32),
        "bn_rmean": 0.05 * jax.random.normal(ks[2], (1, COUT), jnp.float32),
        "bn_rvar": jnp.abs(jax.random.normal(ks[3], (1, COUT), jnp.float32)) + 0.5,
        "w_emb": 0.1 * jax.random.normal(ks[4], (COUT, EMB), jnp.float32),
        "b_emb": 0.1 * jax.random.normal(ks[5], (1, EMB), jnp.float32),
        # regressor: row 0 weights the per-channel means, row 1 the variances
        "w_reg": 0.1 * jax.random.normal(ks[6], (2, COUT), jnp.float32),
        "b_reg": 0.5 * jnp.ones((1,), jnp.float32),
    }


if __name__ == "__main__":
    key = jax.random.PRNGKey(0)
    k_x, k_p = jax.random.split(key)
    x = jax.random.normal(k_x, (B, CIN, H, W), jnp.float32)   # NCHW like PyTorch
    params = init_params(k_p)

    fwd = jax.jit(lambda xx, pp: quality_estimator_forward(xx, pp, return_emb=True))
    emb, quality = fwd(x, params)
    jax.block_until_ready((emb, quality))

    assert emb.shape == (B, EMB)
    assert quality.shape == (B,)
    assert jnp.all(jnp.isfinite(emb)) and jnp.all(jnp.isfinite(quality))
    print("KERNEL_OK")
</pallas_src>

<mosaic_0001>
module attributes {stable_mosaic.version = 11 : i64} {
  func.func @qe_fused_kernel(%arg0: memref<512x36xf32, #tpu.memory_space<vmem>>, %arg1: memref<36x32xf32, #tpu.memory_space<vmem>>, %arg2: memref<1x32xf32, #tpu.memory_space<vmem>>, %arg3: memref<1x32xf32, #tpu.memory_space<vmem>>, %arg4: memref<1x32xf32, #tpu.memory_space<vmem>>, %arg5: memref<32x32xf32, #tpu.memory_space<vmem>>, %arg6: memref<1x32xf32, #tpu.memory_space<vmem>>, %arg7: memref<2x32xf32, #tpu.memory_space<vmem>>, %arg8: memref<1xf32, #tpu.memory_space<smem>>, %arg9: memref<2x32xf32, #tpu.memory_space<vmem>>, %arg10: memref<2x1xf32, #tpu.memory_space<vmem>>) attributes {dimension_semantics = [], scalar_prefetch = 0 : i64, scratch_operands = 0 : i64, tpu.core_type = #tpu.core_type<tc>} {
    %c0 = arith.constant 0 : index
    %c0_0 = arith.constant 0 : index
    %0 = vector.load %arg0[%c0, %c0_0] : memref<512x36xf32, #tpu.memory_space<vmem>>, vector<512x36xf32>
    %c0_1 = arith.constant 0 : index
    %c0_2 = arith.constant 0 : index
    %1 = vector.load %arg1[%c0_1, %c0_2] : memref<36x32xf32, #tpu.memory_space<vmem>>, vector<36x32xf32>
    %cst = arith.constant dense<0.000000e+00> : vector<512x32xf32>
    %2 = tpu.matmul %0, %1, %cst {dimension_numbers = #tpu.dot_dimension_numbers<[1], [0], [0], [1], [0, 0, 1, 1], [], []>} : vector<512x36xf32>, vector<36x32xf32>, vector<512x32xf32> -> vector<512x32xf32>
    %c0_3 = arith.constant 0 : index
    %c0_4 = arith.constant 0 : index
    %3 = vector.load %arg2[%c0_3, %c0_4] : memref<1x32xf32, #tpu.memory_space<vmem>>, vector<1x32xf32>
    %4 = vector.broadcast %3 : vector<1x32xf32> to vector<512x32xf32>
    %5 = arith.addf %2, %4 : vector<512x32xf32>
    %6 = vector.shape_cast %5 : vector<512x32xf32> to vector<2x256x32xf32>
    %cst_5 = arith.constant dense<0.000000e+00> : vector<2x32xf32>
    %7 = vector.multi_reduction <add>, %6, %cst_5 [1] : vector<2x256x32xf32> to vector<2x32xf32>
    %cst_6 = arith.constant 2.560000e+02 : f32
    %8 = vector.broadcast %cst_6 : f32 to vector<2x32xf32>
    %9 = arith.divf %7, %8 : vector<2x32xf32>
    %10 = arith.mulf %6, %6 : vector<2x256x32xf32>
    %cst_7 = arith.constant dense<0.000000e+00> : vector<2x32xf32>
    %11 = vector.multi_reduction <add>, %10, %cst_7 [1] : vector<2x256x32xf32> to vector<2x32xf32>
    %cst_8 = arith.constant 2.560000e+02 : f32
    %12 = vector.broadcast %cst_8 : f32 to vector<2x32xf32>
    %13 = arith.divf %11, %12 : vector<2x32xf32>
    %14 = arith.mulf %9, %9 : vector<2x32xf32>
    %15 = arith.subf %13, %14 : vector<2x32xf32>
    %cst_9 = arith.constant 0.000000e+00 : f32
    %16 = vector.broadcast %cst_9 : f32 to vector<2x32xf32>
    %17 = arith.maximumf %15, %16 : vector<2x32xf32>
    %c0_10 = arith.constant 0 : index
    %c0_11 = arith.constant 0 : index
    %18 = vector.load %arg3[%c0_10, %c0_11] : memref<1x32xf32, #tpu.memory_space<vmem>>, vector<1x32xf32>
    %19 = vector.broadcast %18 : vector<1x32xf32> to vector<512x32xf32>
    %20 = arith.mulf %5, %19 : vector<512x32xf32>
    %c0_12 = arith.constant 0 : index
    %c0_13 = arith.constant 0 : index
    %21 = vector.load %arg4[%c0_12, %c0_13] : memref<1x32xf32, #tpu.memory_space<vmem>>, vector<1x32xf32>
    %22 = vector.broadcast %21 : vector<1x32xf32> to vector<512x32xf32>
    %23 = arith.addf %20, %22 : vector<512x32xf32>
    %cst_14 = arith.constant 0.000000e+00 : f32
    %24 = vector.broadcast %cst_14 : f32 to vector<512x32xf32>
    %25 = arith.maximumf %23, %24 : vector<512x32xf32>
    %26 = vector.shape_cast %25 : vector<512x32xf32> to vector<2x256x32xf32>
    %cst_15 = arith.constant dense<0.000000e+00> : vector<2x32xf32>
    %27 = vector.multi_reduction <add>, %26, %cst_15 [1] : vector<2x256x32xf32> to vector<2x32xf32>
    %cst_16 = arith.constant 2.560000e+02 : f32
    %28 = vector.broadcast %cst_16 : f32 to vector<2x32xf32>
    %29 = arith.divf %27, %28 : vector<2x32xf32>
    %c0_17 = arith.constant 0 : index
    %c0_18 = arith.constant 0 : index
    %30 = vector.load %arg5[%c0_17, %c0_18] : memref<32x32xf32, #tpu.memory_space<vmem>>, vector<32x32xf32>
    %cst_19 = arith.constant dense<0.000000e+00> : vector<2x32xf32>
    %31 = tpu.matmul %29, %30, %cst_19 {dimension_numbers = #tpu.dot_dimension_numbers<[1], [0], [0], [1], [0, 0, 1, 1], [], []>} : vector<2x32xf32>, vector<32x32xf32>, vector<2x32xf32> -> vector<2x32xf32>
    %c0_20 = arith.constant 0 : index
    %c0_21 = arith.constant 0 : index
    %32 = vector.load %arg6[%c0_20, %c0_21] : memref<1x32xf32, #tpu.memory_space<vmem>>, vector<1x32xf32>
    %33 = vector.broadcast %32 : vector<1x32xf32> to vector<2x32xf32>
    %34 = arith.addf %31, %33 : vector<2x32xf32>
    %c0_22 = arith.constant 0 : index
    %c0_23 = arith.constant 0 : index
    %35 = vector.load %arg9[%c0_22, %c0_23] : memref<2x32xf32, #tpu.memory_space<vmem>>, vector<2x32xf32>
    tpu.vector_store %arg9[%c0_22, %c0_23], %34 {strides = array<i32>} : memref<2x32xf32, #tpu.memory_space<vmem>>, vector<2x32xf32>,
    %c0_24 = arith.constant 0 : index
    %c0_25 = arith.constant 0 : index
    %36 = vector.load %arg7[%c0_24, %c0_25] : memref<2x32xf32, #tpu.memory_space<vmem>>, vector<2x32xf32>
    %37 = vector.extract_strided_slice %36 {offsets = [0, 0], sizes = [1, 32], strides = [1, 1]} : vector<2x32xf32> to vector<1x32xf32>
    %38 = vector.broadcast %37 : vector<1x32xf32> to vector<2x32xf32>
    %39 = arith.mulf %9, %38 : vector<2x32xf32>
    %40 = vector.extract_strided_slice %36 {offsets = [1, 0], sizes = [1, 32], strides = [1, 1]} : vector<2x32xf32> to vector<1x32xf32>
    %41 = vector.broadcast %40 : vector<1x32xf32> to vector<2x32xf32>
    %42 = arith.mulf %17, %41 : vector<2x32xf32>
    %43 = arith.addf %39, %42 : vector<2x32xf32>
    %cst_26 = arith.constant dense<0.000000e+00> : vector<2xf32>
    %44 = vector.multi_reduction <add>, %43, %cst_26 [1] : vector<2x32xf32> to vector<2xf32>
    %45 = vector.shape_cast %44 : vector<2xf32> to vector<2x1xf32>
    %c0_27 = arith.constant 0 : index
    %46 = memref.load %arg8[%c0_27] : memref<1xf32, #tpu.memory_space<smem>>
    %47 = vector.broadcast %46 : f32 to vector<2x1xf32>
    %48 = arith.addf %45, %47 : vector<2x1xf32>
    %c0_28 = arith.constant 0 : index
    %c0_29 = arith.constant 0 : index
    %49 = vector.load %arg10[%c0_28, %c0_29] : memref<2x1xf32, #tpu.memory_space<vmem>>, vector<2x1xf32>
    tpu.vector_store %arg10[%c0_28, %c0_29], %48 {strides = array<i32>} : memref<2x1xf32, #tpu.memory_space<vmem>>, vector<2x1xf32>,
    return
  }
}

</mosaic_0001>

<bundles_post_ra>
// kernel: _lambda_.1
= control target key start
LH: loop header
LB: loop body
LE: loop exit
PB: predicated region body
PF: predicated region fallthrough
CT: control target
= control target key end

     0   :  { %vm112_vm0 = vcmask 293888   ;;  %vm305_vm1 = vcmask 1043456   ;;  %s2770_s0 = inlined_call_operand.vmem [shape: f32[512,36], index: 0, kind: input, shape index: {}]   ;;  %s2771_s1 = inlined_call_operand.vmem [shape: f32[36,32], index: 1, kind: input, shape index: {}]   ;;  %s2772_s2 = inlined_call_operand.vmem [shape: f32[1,32], index: 2, kind: input, shape index: {}]   ;;  %s2773_s3 = inlined_call_operand.vmem [shape: f32[1,32], index: 3, kind: input, shape index: {}]   ;;  %s2774_s4 = inlined_call_operand.vmem [shape: f32[1,32], index: 4, kind: input, shape index: {}]   ;;  %s2775_s5 = inlined_call_operand.vmem [shape: f32[32,32], index: 5, kind: input, shape index: {}]   ;;  %s2776_s6 = inlined_call_operand.vmem [shape: f32[1,32], index: 6, kind: input, shape index: {}]   ;;  %s2777_s7 = inlined_call_operand.vmem [shape: f32[2,32], index: 7, kind: input, shape index: {}]   ;;  %s2778_s8 = inlined_call_operand.<no memory space> [shape: f32[1], index: 8, kind: input, shape index: {}]   ;;  %s2779_s9 = inlined_call_operand.hbm [shape: f32[2,32], index: 9, kind: output, shape index: {0}]   ;;  %s2780_s10 = inlined_call_operand.vmem [shape: f32[2,1], index: 10, kind: output, shape index: {1}]  }
   0x1   :  { %v100_v0 = vld [vmem:[%s2771_s1] sm:$0xff]  ;;  %v101_v1 = vld [vmem:[%s2771_s1 + $0x8] sm:$0xff]  ;;  %v102_v2 = vld [vmem:[%s2771_s1 + $0x10] sm:$0xff] }
   0x2   :  { %v1788_v3 = vpack.c.bf16 %v101_v1, %v100_v0  ;;  %v103_v4 = vld [vmem:[%s2771_s1 + $0x18] sm:$0xff]  ;;  %v36_v5 = vld [vmem:[%s2770_s0] sm:$0xff]  ;;  %v37_v8 = vld [vmem:[%s2770_s0 + $0x8] sm:$0xff] }
   0x3   :  { %v1792_v6 = vpack.c.bf16 %v103_v4, %v102_v2  ;;  %1681 = vmatprep.mubr.msk.f32.mxu0 %vm112_vm0, %v36_v5  ;;  %v104_v7 = vld [vmem:[%s2771_s1 + $0x20] sm:$0xf]  ;;  %v38_v9 = vld [vmem:[%s2770_s0 + $0x10] sm:$0xff]  ;;  %v71_v11 = vld [vmem:[%s2770_s0 + $0x118] sm:$0xff] }
   0x4   :  { %1789 = vmatprep.subr.bf16.mxu0 %v1788_v3  ;;  %1802 = vmatprep.subr.bf16.mxu1 %v1788_v3  ;;  %v70_v10 = vld [vmem:[%s2770_s0 + $0x110] sm:$0xff]  ;;  %v72_v12 = vld [vmem:[%s2770_s0 + $0x120] sm:$0xff]  ;;  %v39_v13 = vld [vmem:[%s2770_s0 + $0x18] sm:$0xff] }
   0x5   :  { %1791 = vmatpush3.bf16.msra.mxu0 %v1788_v3  ;;  %1805 = vmatpush3.bf16.msra.mxu1 %v1788_v3  ;;  %v40_v14 = vld [vmem:[%s2770_s0 + $0x20] sm:$0xff]  ;;  %v73_v15 = vld [vmem:[%s2770_s0 + $0x128] sm:$0xff]  ;;  %v74_v16 = vld [vmem:[%s2770_s0 + $0x130] sm:$0xff] }
   0x6   :  { %1793 = vmatprep.subr.bf16.mxu0 %v1792_v6  ;;  %1803 = vmatprep.subr.bf16.mxu1 %v1792_v6  ;;  %v41_v17 = vld [vmem:[%s2770_s0 + $0x28] sm:$0xff]  ;;  %v42_v18 = vld [vmem:[%s2770_s0 + $0x30] sm:$0xff]  ;;  %v75_v19 = vld [vmem:[%s2770_s0 + $0x138] sm:$0xff] }
   0x7   :  { %1732 = vmatprep.mubr.msk.f32.mxu1 %vm112_vm0, %v70_v10  ;;  %v76_v20 = vld [vmem:[%s2770_s0 + $0x140] sm:$0xff]  ;;  %v43_v21 = vld [vmem:[%s2770_s0 + $0x38] sm:$0xff] }
   0x8   :  { %v44_v22 = vld [vmem:[%s2770_s0 + $0x40] sm:$0xff] }
   0x9   :  { %1795 = vmatpush3.bf16.msra.mxu0 %v1792_v6  ;;  %1806 = vmatpush3.bf16.msra.mxu1 %v1792_v6 }
   0xa   :  { %1679 = vmatprep.subr.msk.mxu0 %vm305_vm1, %v104_v7  ;;  %1804 = vmatprep.subr.msk.mxu1 %vm305_vm1, %v104_v7 }
   0xd   :  { %1680 = vmatpush3.msk.msra.mxu0 %vm305_vm1, %v104_v7  ;;  %1807 = vmatpush3.msk.msra.mxu1 %vm305_vm1, %v104_v7 }
   0xe   :  { %1682 = vmatmul.mubr.msk.f32.vlgmr.msra.gmra.mrb[0].mxu0 %vm112_vm0, %v37_v8  ;;  %1733 = vmatmul.mubr.msk.f32.vlgmr.msra.gmra.mrb[0].mxu1 %vm112_vm0, %v71_v11 }
   0xf   :  { %1684 = vmatprep.mubr.msk.f32.mxu0 %vm112_vm0, %v38_v9  ;;  %1735 = vmatprep.mubr.msk.f32.mxu1 %vm112_vm0, %v72_v12 }
  0x12   :  { %1685 = vmatmul.mubr.msk.f32.gmra.mrb[2].mxu0 %vm112_vm0, %v39_v13  ;;  %1736 = vmatmul.mubr.msk.f32.gmra.mrb[2].mxu1 %vm112_vm0, %v73_v15 }
  0x13   :  { %1687 = vmatprep.mubr.msk.f32.mxu0 %vm112_vm0, %v40_v14  ;;  %1738 = vmatprep.mubr.msk.f32.mxu1 %vm112_vm0, %v74_v16 }
  0x16   :  { %1688 = vmatmul.mubr.msk.f32.gmra.mrb[4].mxu0 %vm112_vm0, %v41_v17  ;;  %1739 = vmatmul.mubr.msk.f32.gmra.mrb[4].mxu1 %vm112_vm0, %v75_v19 }
  0x17   :  { %1690 = vmatprep.mubr.msk.f32.mxu0 %vm112_vm0, %v42_v18 }
  0x18   :  { %17 = vsyncpa [#allocation4], 0  ;;  %1741 = vmatprep.mubr.msk.f32.mxu1 %vm112_vm0, %v76_v20  ;;  %v77_v23 = vld [vmem:[%s2770_s0 + $0x148] sm:$0xff]  ;;  %v78_v24 = vld [vmem:[%s2770_s0 + $0x150] sm:$0xff]  ;;  %vm694_vm2 = vcmask 261120   ;;  %vm1840_vm3 = vmmov 0  }
  0x19   :  { %v45_v25 = vld [vmem:[%s2770_s0 + $0x48] sm:$0xff]  ;;  %v46_v26 = vld [vmem:[%s2770_s0 + $0x50] sm:$0xff]  ;;  %v79_v27 = vld [vmem:[%s2770_s0 + $0x158] sm:$0xff]  ;;  %vm1405_vm4 = vcmask 1041409   ;;  %vm1479_vm5 = vcmask 254976   ;;  %vm1507_vm6 = vcmask 1024  }
  0x1a   :  { %1691 = vmatmul.mubr.msk.f32.gmra.mrb[6].mxu0 %vm112_vm0, %v43_v21  ;;  %1742 = vmatmul.mubr.msk.f32.gmra.mrb[6].mxu1 %vm112_vm0, %v77_v23  ;;  %v80_v28 = vld [vmem:[%s2770_s0 + $0x160] sm:$0xff]  ;;  %v47_v29 = vld [vmem:[%s2770_s0 + $0x58] sm:$0xff]  ;;  %v81_v31 = vld [vmem:[%s2770_s0 + $0x168] sm:$0xff]  ;;  %s1842_s26 = smov [#allocation3]  }
  0x1b   :  { %1693 = vmatprep.mubr.msk.f32.mxu0 %vm112_vm0, %v44_v22  ;;  %1744 = vmatprep.mubr.msk.f32.mxu1 %vm112_vm0, %v78_v24  ;;  %v48_v30 = vld [vmem:[%s2770_s0 + $0x60] sm:$0xff]  ;;  %v82_v32 = vld [vmem:[%s2770_s0 + $0x170] sm:$0xff]  ;;  %v49_v33 = vld [vmem:[%s2770_s0 + $0x68] sm:$0xff]  ;;  %s1515_s27 = sshll.u32 %s1842_s26, 4  ;;  %s1516_s27 = int_to_ptr.vmem [resolvable:$true] %s1515_s27 }
  0x1c   :  { %v50_v34 = vld [vmem:[%s2770_s0 + $0x70] sm:$0xff]  ;;  %v83_v35 = vld [vmem:[%s2770_s0 + $0x178] sm:$0xff]  ;;  %v84_v36 = vld [vmem:[%s2770_s0 + $0x180] sm:$0xff]  ;;  %p1820_p1 = scmp.lt.s32.totalorder %s1516_s27, %s1516_s27 }
  0x1d   :  { %v51_v37 = vld [vmem:[%s2770_s0 + $0x78] sm:$0xff]  ;;  %v52_v38 = vld [vmem:[%s2770_s0 + $0x80] sm:$0xff]  ;;  %v85_v39 = vld [vmem:[%s2770_s0 + $0x188] sm:$0xff] }
  0x1e   :  { %1694 = vmatmul.mubr.msk.f32.gmra.mrb[8].mxu0 %vm112_vm0, %v45_v25  ;;  %1745 = vmatmul.mubr.msk.f32.gmra.mrb[8].mxu1 %vm112_vm0, %v79_v27  ;;  %v86_v40 = vld [vmem:[%s2770_s0 + $0x190] sm:$0xff]  ;;  %v53_v41 = vld [vmem:[%s2770_s0 + $0x88] sm:$0xff]  ;;  %v87_v43 = vld [vmem:[%s2770_s0 + $0x198] sm:$0xff] }
  0x1f   :  { %1696 = vmatprep.mubr.msk.f32.mxu0 %vm112_vm0, %v46_v26  ;;  %1747 = vmatprep.mubr.msk.f32.mxu1 %vm112_vm0, %v80_v28  ;;  %v54_v42 = vld [vmem:[%s2770_s0 + $0x90] sm:$0xff]  ;;  %v88_v44 = vld [vmem:[%s2770_s0 + $0x1a0] sm:$0xff]  ;;  %v55_v45 = vld [vmem:[%s2770_s0 + $0x98] sm:$0xff] }
  0x20   :  { %v56_v46 = vld [vmem:[%s2770_s0 + $0xa0] sm:$0xff]  ;;  %v89_v47 = vld [vmem:[%s2770_s0 + $0x1a8] sm:$0xff]  ;;  %v90_v48 = vld [vmem:[%s2770_s0 + $0x1b0] sm:$0xff] }
  0x21   :  { %v57_v49 = vld [vmem:[%s2770_s0 + $0xa8] sm:$0xff]  ;;  %v58_v50 = vld [vmem:[%s2770_s0 + $0xb0] sm:$0xff]  ;;  %v91_v51 = vld [vmem:[%s2770_s0 + $0x1b8] sm:$0xff] }
  0x22   :  { %1697 = vmatmul.mubr.msk.f32.gmra.mrb[10].mxu0 %vm112_vm0, %v47_v29  ;;  %1748 = vmatmul.mubr.msk.f32.gmra.mrb[10].mxu1 %vm112_vm0, %v81_v31  ;;  %v92_v52 = vld [vmem:[%s2770_s0 + $0x1c0] sm:$0xff]  ;;  %v59_v53 = vld [vmem:[%s2770_s0 + $0xb8] sm:$0xff]  ;;  %v93_v55 = vld [vmem:[%s2770_s0 + $0x1c8] sm:$0xff] }
  0x23   :  { %1699 = vmatprep.mubr.msk.f32.mxu0 %vm112_vm0, %v48_v30  ;;  %1750 = vmatprep.mubr.msk.f32.mxu1 %vm112_vm0, %v82_v32  ;;  %v60_v54 = vld [vmem:[%s2770_s0 + $0xc0] sm:$0xff]  ;;  %v94_v56 = vld [vmem:[%s2770_s0 + $0x1d0] sm:$0xff]  ;;  %v61_v57 = vld [vmem:[%s2770_s0 + $0xc8] sm:$0xff] }
  0x24   :  { %v62_v58 = vld [vmem:[%s2770_s0 + $0xd0] sm:$0xff]  ;;  %v95_v59 = vld [vmem:[%s2770_s0 + $0x1d8] sm:$0xff]  ;;  %v96_v60 = vld [vmem:[%s2770_s0 + $0x1e0] sm:$0xff] }
  0x25   :  { %v63_v61 = vld [vmem:[%s2770_s0 + $0xd8] sm:$0xff]  ;;  %v64_v62 = vld [vmem:[%s2770_s0 + $0xe0] sm:$0xff]  ;;  %v97_v63 = vld [vmem:[%s2770_s0 + $0x1e8] sm:$0xff] }
  0x26   :  { %1700 = vmatmul.mubr.msk.f32.gmra.mrb[12].mxu0 %vm112_vm0, %v49_v33  ;;  %1751 = vmatmul.mubr.msk.f32.gmra.mrb[12].mxu1 %vm112_vm0, %v83_v35  ;;  %v98_v0 = vld [vmem:[%s2770_s0 + $0x1f0] sm:$0xff]  ;;  %v65_v1 = vld [vmem:[%s2770_s0 + $0xe8] sm:$0xff]  ;;  %v99_v3 = vld [vmem:[%s2770_s0 + $0x1f8] sm:$0xff] }
  0x27   :  { %1702 = vmatprep.mubr.msk.f32.mxu0 %vm112_vm0, %v50_v34  ;;  %1753 = vmatprep.mubr.msk.f32.mxu1 %vm112_vm0, %v84_v36  ;;  %v66_v2 = vld [vmem:[%s2770_s0 + $0xf0] sm:$0xff]  ;;  %v67_v4 = vld [vmem:[%s2770_s0 + $0xf8] sm:$0xff]  ;;  %v68_v5 = vld [vmem:[%s2770_s0 + $0x100] sm:$0xff] }
  0x28   :  { %v69_v6 = vld [vmem:[%s2770_s0 + $0x108] sm:$0xff]  ;;  %v2172_v7 = vld [vmem:[%s2772_s2] ss:$0 sm:$0xff] }
  0x29   :  { %v2177_v9 = vld [vmem:[%s2773_s3] ss:$0 sm:$0xff] }
  0x2a   :  { %1703 = vmatmul.mubr.msk.f32.gmra.mrb[14].mxu0 %vm112_vm0, %v51_v37  ;;  %1754 = vmatmul.mubr.msk.f32.gmra.mrb[14].mxu1 %vm112_vm0, %v85_v39  ;;  %v2183_v12 = vld [vmem:[%s2774_s4] ss:$0 sm:$0xff] }
  0x2b   :  { %1705 = vmatprep.mubr.msk.f32.mxu0 %vm112_vm0, %v52_v38  ;;  %1756 = vmatprep.mubr.msk.f32.mxu1 %vm112_vm0, %v86_v40 }
  0x2e   :  { %1706 = vmatmul.mubr.msk.f32.gmra.mrb[16].mxu0 %vm112_vm0, %v53_v41  ;;  %1757 = vmatmul.mubr.msk.f32.gmra.mrb[16].mxu1 %vm112_vm0, %v87_v43 }
  0x2f   :  { %1708 = vmatprep.mubr.msk.f32.mxu0 %vm112_vm0, %v54_v42  ;;  %1759 = vmatprep.mubr.msk.f32.mxu1 %vm112_vm0, %v88_v44 }
  0x32   :  { %1709 = vmatmul.mubr.msk.f32.gmra.mrb[18].mxu0 %vm112_vm0, %v55_v45  ;;  %1760 = vmatmul.mubr.msk.f32.gmra.mrb[18].mxu1 %vm112_vm0, %v89_v47 }
  0x33   :  { %1711 = vmatprep.mubr.msk.f32.mxu0 %vm112_vm0, %v56_v46  ;;  %1762 = vmatprep.mubr.msk.f32.mxu1 %vm112_vm0, %v90_v48 }
  0x36   :  { %1712 = vmatmul.mubr.msk.f32.gmra.mrb[20].mxu0 %vm112_vm0, %v57_v49  ;;  %1763 = vmatmul.mubr.msk.f32.gmra.mrb[20].mxu1 %vm112_vm0, %v91_v51 }
  0x37   :  { %1714 = vmatprep.mubr.msk.f32.mxu0 %vm112_vm0, %v58_v50  ;;  %1765 = vmatprep.mubr.msk.f32.mxu1 %vm112_vm0, %v92_v52 }
  0x3a   :  { %1715 = vmatmul.mubr.msk.f32.gmra.mrb[22].mxu0 %vm112_vm0, %v59_v53  ;;  %1766 = vmatmul.mubr.msk.f32.gmra.mrb[22].mxu1 %vm112_vm0, %v93_v55 }
  0x3b   :  { %1717 = vmatprep.mubr.msk.f32.mxu0 %vm112_vm0, %v60_v54  ;;  %1768 = vmatprep.mubr.msk.f32.mxu1 %vm112_vm0, %v94_v56 }
  0x3e   :  { %1718 = vmatmul.mubr.msk.f32.gmra.mrb[24].mxu0 %vm112_vm0, %v61_v57  ;;  %1769 = vmatmul.mubr.msk.f32.gmra.mrb[24].mxu1 %vm112_vm0, %v95_v59 }
  0x3f   :  { %1720 = vmatprep.mubr.msk.f32.mxu0 %vm112_vm0, %v62_v58  ;;  %1771 = vmatprep.mubr.msk.f32.mxu1 %vm112_vm0, %v96_v60 }
  0x42   :  { %1721 = vmatmul.mubr.msk.f32.gmra.mrb[26].mxu0 %vm112_vm0, %v63_v61  ;;  %1772 = vmatmul.mubr.msk.f32.gmra.mrb[26].mxu1 %vm112_vm0, %v97_v63 }
  0x43   :  { %1723 = vmatprep.mubr.msk.f32.mxu0 %vm112_vm0, %v64_v62  ;;  %1774 = vmatprep.mubr.msk.f32.mxu1 %vm112_vm0, %v98_v0 }
  0x46   :  { %1724 = vmatmul.mubr.msk.f32.gmra.mrb[28].mxu0 %vm112_vm0, %v65_v1  ;;  %1775 = vmatmul.mubr.msk.f32.gmra.mrb[28].mxu1 %vm112_vm0, %v99_v3 }
  0x47   :  { %1726 = vmatprep.mubr.msk.f32.mxu0 %vm112_vm0, %v66_v2 }
  0x4a   :  { %1727 = vmatmul.mubr.msk.f32.gmra.mrb[30].mxu0 %vm112_vm0, %v67_v4 }
  0x4b   :  { %1729 = vmatprep.mubr.msk.f32.mxu0 %vm112_vm0, %v68_v5 }
  0x4e   :  { %1730 = vmatmul.mubr.msk.f32.gmra.mrb[32].mxu0 %vm112_vm0, %v69_v6 }
  0xe1   :  { %v1683_v8 = vpop.f32.mrb[0].mxu0  ;;  %v2186_v14 = vpop.f32.mrb[0].mxu1 }
  0xe2   :  { %v381_v10 = vadd.f32 %v1683_v8, %v2172_v7  ;;  %v375_v11 = vpop.f32.mrb[1].mxu0  ;;  %v2190_v18 = vpop.f32.mrb[1].mxu1 }
  0xe3   :  { %v376_v13 = vadd.f32 %v2172_v7, %v375_v11 }
  0xe4   :  { %v696_v15 = vsel %vm694_vm2, %v381_v10, 0.0  ;;  %v837_v16 = vmul.f32 %v381_v10, %v381_v10  ;;  %v1054_v17 = vmul.f32 %v2177_v9, %v381_v10 }
  0xe5   :  { %v695_v19 = vsel %vm694_vm2, %v376_v13, 0.0  ;;  %v836_v20 = vmul.f32 %v376_v13, %v376_v13  ;;  %v1053_v21 = vmul.f32 %v2177_v9, %v376_v13  ;;  %v1686_v22 = vpop.f32.mrb[2].mxu0  ;;  %v2200_v31 = vpop.f32.mrb[2].mxu1 }
  0xe6   :  { %v901_v23 = vsel %vm694_vm2, %v837_v16, 0.0  ;;  %v1125_v24 = vadd.f32 %v2183_v12, %v1054_v17  ;;  %v697_v25 = vadd.f32 %v696_v15, %v695_v19  ;;  %v391_v26 = vadd.f32 %v1686_v22, %v2172_v7  ;;  %v385_v27 = vpop.f32.mrb[3].mxu0  ;;  %v2203_v36 = vpop.f32.mrb[3].mxu1 }
  0xe7   :  { %v900_v28 = vsel %vm694_vm2, %v836_v20, 0.0  ;;  %v1124_v29 = vadd.f32 %v2183_v12, %v1053_v21  ;;  %v386_v30 = vadd.f32 %v2172_v7, %v385_v27 }
  0xe8   :  { %v1189_v32 = vmax.f32 %v1125_v24, 0.0  ;;  %v902_v33 = vadd.f32 %v901_v23, %v900_v28  ;;  %v700_v34 = vsel %vm694_vm2, %v391_v26, 0.0  ;;  %v839_v35 = vmul.f32 %v391_v26, %v391_v26 }
  0xe9   :  { %v1188_v37 = vmax.f32 %v1124_v29, 0.0  ;;  %v1056_v38 = vmul.f32 %v2177_v9, %v391_v26  ;;  %v698_v39 = vsel %vm694_vm2, %v386_v30, 0.0  ;;  %v838_v40 = vmul.f32 %v386_v30, %v386_v30  ;;  %v1689_v41 = vpop.f32.mrb[4].mxu0  ;;  %v2214_v51 = vpop.f32.mrb[4].mxu1 }
  0xea   :  { %v1253_v42 = vsel %vm694_vm2, %v1189_v32, 0.0  ;;  %v905_v43 = vsel %vm694_vm2, %v839_v35, 0.0  ;;  %v699_v44 = vadd.f32 %v698_v39, %v697_v25  ;;  %v1055_v45 = vmul.f32 %v2177_v9, %v386_v30  ;;  %v395_v46 = vpop.f32.mrb[5].mxu0  ;;  %v2218_v56 = vpop.f32.mrb[5].mxu1 }
  0xeb   :  { %v1252_v47 = vsel %vm694_vm2, %v1188_v37, 0.0  ;;  %v1127_v48 = vadd.f32 %v2183_v12, %v1056_v38  ;;  %v903_v49 = vsel %vm694_vm2, %v838_v40, 0.0  ;;  %v401_v50 = vadd.f32 %v1689_v41, %v2172_v7 }
  0xec   :  { %v1254_v52 = vadd.f32 %v1253_v42, %v1252_v47  ;;  %v904_v53 = vadd.f32 %v903_v49, %v902_v33  ;;  %v1126_v54 = vadd.f32 %v2183_v12, %v1055_v45  ;;  %v396_v55 = vadd.f32 %v2172_v7, %v395_v46 }
  0xed   :  { %v1191_v57 = vmax.f32 %v1127_v48, 0.0  ;;  %v704_v58 = vsel %vm694_vm2, %v401_v50, 0.0  ;;  %v841_v59 = vmul.f32 %v401_v50, %v401_v50  ;;  %v1058_v60 = vmul.f32 %v2177_v9, %v401_v50  ;;  %v1692_v61 = vpop.f32.mrb[6].mxu0  ;;  %v2226_v8 = vpop.f32.mrb[6].mxu1 }
  0xee   :  { %v1190_v62 = vmax.f32 %v1126_v54, 0.0  ;;  %v701_v63 = vadd.f32 %v700_v34, %v699_v44  ;;  %v702_v0 = vsel %vm694_vm2, %v396_v55, 0.0  ;;  %v840_v1 = vmul.f32 %v396_v55, %v396_v55  ;;  %v405_v2 = vpop.f32.mrb[7].mxu0  ;;  %v2231_v16 = vpop.f32.mrb[7].mxu1 }
  0xef   :  { %v1257_v3 = vsel %vm694_vm2, %v1191_v57, 0.0  ;;  %v909_v4 = vsel %vm694_vm2, %v841_v59, 0.0  ;;  %v1129_v5 = vadd.f32 %v2183_v12, %v1058_v60  ;;  %v906_v6 = vadd.f32 %v905_v43, %v904_v53 }
  0xf0   :  { %v1255_v10 = vsel %vm694_vm2, %v1190_v62, 0.0  ;;  %v703_v11 = vadd.f32 %v702_v0, %v701_v63  ;;  %v907_v13 = vsel %vm694_vm2, %v840_v1, 0.0  ;;  %v1057_v15 = vmul.f32 %v2177_v9, %v396_v55 }
  0xf1   :  { %v1256_v17 = vadd.f32 %v1255_v10, %v1254_v52  ;;  %v1193_v19 = vmax.f32 %v1129_v5, 0.0  ;;  %v908_v20 = vadd.f32 %v907_v13, %v906_v6  ;;  %v411_v21 = vadd.f32 %v1692_v61, %v2172_v7  ;;  %v1695_v22 = vpop.f32.mrb[8].mxu0  ;;  %v2239_v33 = vpop.f32.mrb[8].mxu1 }
  0xf2   :  { %v1128_v23 = vadd.f32 %v2183_v12, %v1057_v15  ;;  %v406_v24 = vadd.f32 %v2172_v7, %v405_v2  ;;  %v705_v25 = vadd.f32 %v704_v58, %v703_v11  ;;  %v421_v26 = vadd.f32 %v1695_v22, %v2172_v7  ;;  %v415_v27 = vpop.f32.mrb[9].mxu0  ;;  %v2243_v39 = vpop.f32.mrb[9].mxu1 }
  0xf3   :  { %v1261_v28 = vsel %vm694_vm2, %v1193_v19, 0.0  ;;  %v1258_v29 = vadd.f32 %v1257_v3, %v1256_v17  ;;  %v708_v30 = vsel %vm694_vm2, %v411_v21, 0.0  ;;  %v843_v32 = vmul.f32 %v411_v21, %v411_v21 }
  0xf4   :  { %v1192_v34 = vmax.f32 %v1128_v23, 0.0  ;;  %v1060_v35 = vmul.f32 %v2177_v9, %v411_v21  ;;  %v706_v37 = vsel %vm694_vm2, %v406_v24, 0.0  ;;  %v842_v38 = vmul.f32 %v406_v24, %v406_v24 }
  0xf5   :  { %v913_v40 = vsel %vm694_vm2, %v843_v32, 0.0  ;;  %v707_v41 = vadd.f32 %v706_v37, %v705_v25  ;;  %v910_v42 = vadd.f32 %v909_v4, %v908_v20  ;;  %v1059_v43 = vmul.f32 %v2177_v9, %v406_v24  ;;  %v1698_v44 = vpop.f32.mrb[10].mxu0  ;;  %v2252_v55 = vpop.f32.mrb[10].mxu1 }
  0xf6   :  { %v1259_v45 = vsel %vm694_vm2, %v1192_v34, 0.0  ;;  %v1131_v46 = vadd.f32 %v2183_v12, %v1060_v35  ;;  %v911_v47 = vsel %vm694_vm2, %v842_v38, 0.0  ;;  %v712_v48 = vsel %vm694_vm2, %v421_v26, 0.0  ;;  %v425_v49 = vpop.f32.mrb[11].mxu0  ;;  %v2256_v61 = vpop.f32.mrb[11].mxu1 }
  0xf7   :  { %v1260_v50 = vadd.f32 %v1259_v45, %v1258_v29  ;;  %v912_v52 = vadd.f32 %v911_v47, %v910_v42  ;;  %v1130_v53 = vadd.f32 %v2183_v12, %v1059_v43  ;;  %v845_v54 = vmul.f32 %v421_v26, %v421_v26 }
  0xf8   :  { %v1195_v57 = vmax.f32 %v1131_v46, 0.0  ;;  %v1062_v58 = vmul.f32 %v2177_v9, %v421_v26  ;;  %v416_v59 = vadd.f32 %v2172_v7, %v415_v27  ;;  %v709_v60 = vadd.f32 %v708_v30, %v707_v41 }
  0xf9   :  { %v1194_v62 = vmax.f32 %v1130_v53, 0.0  ;;  %v1262_v63 = vadd.f32 %v1261_v28, %v1260_v50  ;;  %v917_v0 = vsel %vm694_vm2, %v845_v54, 0.0  ;;  %v914_v1 = vadd.f32 %v913_v40, %v912_v52  ;;  %v1701_v2 = vpop.f32.mrb[12].mxu0  ;;  %v2265_v19 = vpop.f32.mrb[12].mxu1 }
  0xfa   :  { %v1265_v3 = vsel %vm694_vm2, %v1195_v57, 0.0  ;;  %v1133_v4 = vadd.f32 %v2183_v12, %v1062_v58  ;;  %v710_v5 = vsel %vm694_vm2, %v416_v59, 0.0  ;;  %v844_v6 = vmul.f32 %v416_v59, %v416_v59  ;;  %v435_v10 = vpop.f32.mrb[13].mxu0  ;;  %v2269_v24 = vpop.f32.mrb[13].mxu1 }
  0xfb   :  { %v1263_v11 = vsel %vm694_vm2, %v1194_v62, 0.0  ;;  %v711_v13 = vadd.f32 %v710_v5, %v709_v60  ;;  %v1061_v15 = vmul.f32 %v2177_v9, %v416_v59  ;;  %v431_v17 = vadd.f32 %v1698_v44, %v2172_v7 }
  0xfc   :  { %v1264_v20 = vadd.f32 %v1263_v11, %v1262_v63  ;;  %v1197_v21 = vmax.f32 %v1133_v4, 0.0  ;;  %v915_v22 = vsel %vm694_vm2, %v844_v6, 0.0  ;;  %v426_v23 = vadd.f32 %v2172_v7, %v425_v49 }
  0xfd   :  { %v916_v25 = vadd.f32 %v915_v22, %v914_v1  ;;  %v1132_v26 = vadd.f32 %v2183_v12, %v1061_v15  ;;  %v716_v27 = vsel %vm694_vm2, %v431_v17, 0.0  ;;  %v847_v28 = vmul.f32 %v431_v17, %v431_v17  ;;  %v1704_v29 = vpop.f32.mrb[14].mxu0  ;;  %v2277_v43 = vpop.f32.mrb[14].mxu1 }
  0xfe   :  { %v1269_v30 = vsel %vm694_vm2, %v1197_v21, 0.0  ;;  %v1266_v32 = vadd.f32 %v1265_v3, %v1264_v20  ;;  %v1064_v34 = vmul.f32 %v2177_v9, %v431_v17  ;;  %v713_v35 = vadd.f32 %v712_v48, %v711_v13  ;;  %v445_v37 = vpop.f32.mrb[15].mxu0  ;;  %v2281_v49 = vpop.f32.mrb[15].mxu1 }
  0xff   :  { %v1196_v38 = vmax.f32 %v1132_v26, 0.0  ;;  %v921_v40 = vsel %vm694_vm2, %v847_v28, 0.0  ;;  %v714_v41 = vsel %vm694_vm2, %v426_v23, 0.0  ;;  %v846_v42 = vmul.f32 %v426_v23, %v426_v23 }
 0x100   :  { %v1135_v44 = vadd.f32 %v2183_v12, %v1064_v34  ;;  %v715_v45 = vadd.f32 %v714_v41, %v713_v35  ;;  %v918_v46 = vadd.f32 %v917_v0, %v916_v25  ;;  %v1063_v47 = vmul.f32 %v2177_v9, %v426_v23 }
 0x101   :  { %v1267_v50 = vsel %vm694_vm2, %v1196_v38, 0.0  ;;  %v919_v48 = vsel %vm694_vm2, %v846_v42, 0.0  ;;  %v441_v52 = vadd.f32 %v1701_v2, %v2172_v7  ;;  %v436_v53 = vadd.f32 %v2172_v7, %v435_v10  ;;  %v1707_v54 = vpop.f32.mrb[16].mxu0  ;;  %v2290_v4 = vpop.f32.mrb[16].mxu1 }
 0x102   :  { %v1268_v57 = vadd.f32 %v1267_v50, %v1266_v32  ;;  %v1199_v58 = vmax.f32 %v1135_v44, 0.0  ;;  %v920_v59 = vadd.f32 %v919_v48, %v918_v46  ;;  %v1134_v60 = vadd.f32 %v2183_v12, %v1063_v47  ;;  %v455_v62 = vpop.f32.mrb[17].mxu0  ;;  %v2294_v11 = vpop.f32.mrb[17].mxu1 }
 0x103   :  { %v720_v63 = vsel %vm694_vm2, %v441_v52, 0.0  ;;  %v849_v0 = vmul.f32 %v441_v52, %v441_v52  ;;  %v1066_v1 = vmul.f32 %v2177_v9, %v441_v52  ;;  %v717_v3 = vadd.f32 %v716_v27, %v715_v45 }
 0x104   :  { %v1273_v5 = vsel %vm694_vm2, %v1199_v58, 0.0  ;;  %v1198_v2 = vmax.f32 %v1134_v60, 0.0  ;;  %v1270_v6 = vadd.f32 %v1269_v30, %v1268_v57  ;;  %v718_v10 = vsel %vm694_vm2, %v436_v53, 0.0 }
 0x105   :  { %v925_v13 = vsel %vm694_vm2, %v849_v0, 0.0  ;;  %v1137_v15 = vadd.f32 %v2183_v12, %v1066_v1  ;;  %v719_v17 = vadd.f32 %v718_v10, %v717_v3  ;;  %v848_v20 = vmul.f32 %v436_v53, %v436_v53  ;;  %v1710_v21 = vpop.f32.mrb[18].mxu0  ;;  %v2303_v35 = vpop.f32.mrb[18].mxu1 }
 0x106   :  { %v1271_v22 = vsel %vm694_vm2, %v1198_v2, 0.0  ;;  %v922_v23 = vadd.f32 %v921_v40, %v920_v59  ;;  %v1065_v25 = vmul.f32 %v2177_v9, %v436_v53  ;;  %v451_v26 = vadd.f32 %v1704_v29, %v2172_v7  ;;  %v465_v27 = vpop.f32.mrb[19].mxu0  ;;  %v2307_v40 = vpop.f32.mrb[19].mxu1 }
 0x107   :  { %v1272_v28 = vadd.f32 %v1271_v22, %v1270_v6  ;;  %v1201_v30 = vmax.f32 %v1137_v15, 0.0  ;;  %v923_v32 = vsel %vm694_vm2, %v848_v20, 0.0  ;;  %v446_v34 = vadd.f32 %v2172_v7, %v445_v37 }
 0x108   :  { %v924_v38 = vadd.f32 %v923_v32, %v922_v23  ;;  %v1136_v41 = vadd.f32 %v2183_v12, %v1065_v25  ;;  %v724_v42 = vsel %vm694_vm2, %v451_v26, 0.0  ;;  %v851_v44 = vmul.f32 %v451_v26, %v451_v26 }
 0x109   :  { %v1277_v45 = vsel %vm694_vm2, %v1201_v30, 0.0  ;;  %v1274_v29 = vadd.f32 %v1273_v5, %v1272_v28  ;;  %v1068_v46 = vmul.f32 %v2177_v9, %v451_v26  ;;  %v721_v47 = vadd.f32 %v720_v63, %v719_v17  ;;  %v2311_v50 = vpop.f32.mrb[20].mxu0  ;;  %v2319_v1 = vpop.f32.mrb[20].mxu1 }
 0x10a   :  { %v1200_v48 = vmax.f32 %v1136_v41, 0.0  ;;  %v929_v37 = vsel %vm694_vm2, %v851_v44, 0.0  ;;  %v722_v52 = vsel %vm694_vm2, %v446_v34, 0.0  ;;  %v850_v53 = vmul.f32 %v446_v34, %v446_v34  ;;  %v2315_v57 = vpop.f32.mrb[21].mxu0  ;;  %v2325_v6 = vpop.f32.mrb[21].mxu1 }
 0x10b   :  { %v1139_v58 = vadd.f32 %v2183_v12, %v1068_v46  ;;  %v723_v59 = vadd.f32 %v722_v52, %v721_v47  ;;  %v926_v60 = vadd.f32 %v925_v13, %v924_v38  ;;  %v1067_v0 = vmul.f32 %v2177_v9, %v446_v34 }
 0x10c   :  { %v1275_v63 = vsel %vm694_vm2, %v1200_v48, 0.0  ;;  %v927_v3 = vsel %vm694_vm2, %v850_v53, 0.0  ;;  %v461_v5 = vadd.f32 %v1707_v54, %v2172_v7  ;;  %v456_v2 = vadd.f32 %v2172_v7, %v455_v62 }
 0x10d   :  { %v1276_v10 = vadd.f32 %v1275_v63, %v1274_v29  ;;  %v1203_v15 = vmax.f32 %v1139_v58, 0.0  ;;  %v928_v17 = vadd.f32 %v927_v3, %v926_v60  ;;  %v1138_v20 = vadd.f32 %v2183_v12, %v1067_v0  ;;  %v2328_v13 = vpop.f32.mrb[22].mxu0  ;;  %v2336_v34 = vpop.f32.mrb[22].mxu1 }
 0x10e   :  { %v728_v22 = vsel %vm694_vm2, %v461_v5, 0.0  ;;  %v853_v23 = vmul.f32 %v461_v5, %v461_v5  ;;  %v1070_v25 = vmul.f32 %v2177_v9, %v461_v5  ;;  %v725_v26 = vadd.f32 %v724_v42, %v723_v59  ;;  %v2332_v28 = vpop.f32.mrb[23].mxu0  ;;  %v2340_v46 = vpop.f32.mrb[23].mxu1 }
 0x10f   :  { %v1281_v54 = vsel %vm694_vm2, %v1203_v15, 0.0  ;;  %v1202_v62 = vmax.f32 %v1138_v20, 0.0  ;;  %v1278_v30 = vadd.f32 %v1277_v45, %v1276_v10  ;;  %v726_v32 = vsel %vm694_vm2, %v456_v2, 0.0 }
 0x110   :  { %v933_v38 = vsel %vm694_vm2, %v853_v23, 0.0  ;;  %v1141_v41 = vadd.f32 %v2183_v12, %v1070_v25  ;;  %v727_v44 = vadd.f32 %v726_v32, %v725_v26  ;;  %v852_v29 = vmul.f32 %v456_v2, %v456_v2 }
 0x111   :  { %v1279_v42 = vsel %vm694_vm2, %v1202_v62, 0.0  ;;  %v930_v47 = vadd.f32 %v929_v37, %v928_v17  ;;  %v1069_v48 = vmul.f32 %v2177_v9, %v456_v2  ;;  %v471_v52 = vadd.f32 %v1710_v21, %v2172_v7  ;;  %v2345_v45 = vpop.f32.mrb[24].mxu0  ;;  %v2353_v10 = vpop.f32.mrb[24].mxu1 }
 0x112   :  { %v1280_v53 = vadd.f32 %v1279_v42, %v1278_v30  ;;  %v1205_v58 = vmax.f32 %v1141_v41, 0.0  ;;  %v931_v59 = vsel %vm694_vm2, %v852_v29, 0.0  ;;  %v466_v60 = vadd.f32 %v2172_v7, %v465_v27  ;;  %v2349_v0 = vpop.f32.mrb[25].mxu0  ;;  %v2357_v20 = vpop.f32.mrb[25].mxu1 }
 0x113   :  { %v932_v63 = vadd.f32 %v931_v59, %v930_v47  ;;  %v1140_v3 = vadd.f32 %v2183_v12, %v1069_v48  ;;  %v732_v5 = vsel %vm694_vm2, %v471_v52, 0.0  ;;  %v855_v37 = vmul.f32 %v471_v52, %v471_v52 }
 0x114   :  { %v1285_v21 = vsel %vm694_vm2, %v1205_v58, 0.0  ;;  %v1282_v2 = vadd.f32 %v1281_v54, %v1280_v53  ;;  %v1072_v15 = vmul.f32 %v2177_v9, %v471_v52  ;;  %v729_v17 = vadd.f32 %v728_v22, %v727_v44 }
 0x115   :  { %v1204_v23 = vmax.f32 %v1140_v3, 0.0  ;;  %v937_v27 = vsel %vm694_vm2, %v855_v37, 0.0  ;;  %v730_v25 = vsel %vm694_vm2, %v466_v60, 0.0  ;;  %v854_v26 = vmul.f32 %v466_v60, %v466_v60  ;;  %v2361_v62 = vpop.f32.mrb[26].mxu0  ;;  %v2373_v48 = vpop.f32.mrb[26].mxu1 }
 0x116   :  { %v1143_v30 = vadd.f32 %v2183_v12, %v1072_v15  ;;  %v731_v32 = vadd.f32 %v730_v25, %v729_v17  ;;  %v934_v41 = vadd.f32 %v933_v38, %v932_v63  ;;  %v1071_v29 = vmul.f32 %v2177_v9, %v466_v60  ;;  %v2365_v54 = vpop.f32.mrb[27].mxu0  ;;  %v2376_v59 = vpop.f32.mrb[27].mxu1 }
 0x117   :  { %v1283_v22 = vsel %vm694_vm2, %v1204_v23, 0.0  ;;  %v935_v44 = vsel %vm694_vm2, %v854_v26, 0.0  ;;  %v481_v42 = vadd.f32 %v2311_v50, %v2172_v7  ;;  %v476_v47 = vadd.f32 %v2172_v7, %v2315_v57 }
 0x118   :  { %v1284_v52 = vadd.f32 %v1283_v22, %v1282_v2  ;;  %v1207_v53 = vmax.f32 %v1143_v30, 0.0  ;;  %v936_v58 = vadd.f32 %v935_v44, %v934_v41  ;;  %v1142_v38 = vadd.f32 %v2183_v12, %v1071_v29 }
 0x119   :  { %v736_v60 = vsel %vm694_vm2, %v481_v42, 0.0  ;;  %v857_v63 = vmul.f32 %v481_v42, %v481_v42  ;;  %v1074_v3 = vmul.f32 %v2177_v9, %v481_v42  ;;  %v733_v37 = vadd.f32 %v732_v5, %v731_v32  ;;  %v2380_v15 = vpop.f32.mrb[28].mxu0  ;;  %v2388_v29 = vpop.f32.mrb[28].mxu1 }
 0x11a   :  { %v1289_v50 = vsel %vm694_vm2, %v1207_v53, 0.0  ;;  %v1206_v57 = vmax.f32 %v1142_v38, 0.0  ;;  %v1286_v17 = vadd.f32 %v1285_v21, %v1284_v52  ;;  %v734_v2 = vsel %vm694_vm2, %v476_v47, 0.0  ;;  %v2384_v23 = vpop.f32.mrb[29].mxu0  ;;  %2781 = vst [vmem:[#allocation6_spill] sm:$0xff] %v2388_v29  ;;  %v2394_v44 = vpop.f32.mrb[29].mxu1 }
 0x11b   :  { %v941_v25 = vsel %vm694_vm2, %v857_v63, 0.0  ;;  %v1145_v26 = vadd.f32 %v2183_v12, %v1074_v3  ;;  %v735_v30 = vadd.f32 %v734_v2, %v733_v37  ;;  %v856_v41 = vmul.f32 %v476_v47, %v476_v47  ;;  %2782 = vst [vmem:[#allocation7_spill] sm:$0xff] %v2394_v44 }
 0x11c   :  { %v1287_v5 = vsel %vm694_vm2, %v1206_v57, 0.0  ;;  %v938_v32 = vadd.f32 %v937_v27, %v936_v58  ;;  %v1073_v22 = vmul.f32 %v2177_v9, %v476_v47  ;;  %v491_v21 = vadd.f32 %v2328_v13, %v2172_v7 }
 0x11d   :  { %v1288_v42 = vadd.f32 %v1287_v5, %v1286_v17  ;;  %v1209_v52 = vmax.f32 %v1145_v26, 0.0  ;;  %v939_v53 = vsel %vm694_vm2, %v856_v41, 0.0  ;;  %v486_v38 = vadd.f32 %v2172_v7, %v2332_v28  ;;  %v2399_v63 = vpop.f32.mrb[30].mxu0 }
 0x11e   :  { %v940_v3 = vadd.f32 %v939_v53, %v938_v32  ;;  %v1144_v37 = vadd.f32 %v2183_v12, %v1073_v22  ;;  %v740_v27 = vsel %vm694_vm2, %v491_v21, 0.0  ;;  %v859_v47 = vmul.f32 %v491_v21, %v491_v21  ;;  %v2403_v58 = vpop.f32.mrb[31].mxu0 }
 0x11f   :  { %v1293_v13 = vsel %vm694_vm2, %v1209_v52, 0.0  ;;  %v1290_v57 = vadd.f32 %v1289_v50, %v1288_v42  ;;  %v1076_v17 = vmul.f32 %v2177_v9, %v491_v21  ;;  %v737_v2 = vadd.f32 %v736_v60, %v735_v30 }
 0x120   :  { %v1208_v26 = vmax.f32 %v1144_v37, 0.0  ;;  %v945_v41 = vsel %vm694_vm2, %v859_v47, 0.0  ;;  %v738_v28 = vsel %vm694_vm2, %v486_v38, 0.0  ;;  %v858_v5 = vmul.f32 %v486_v38, %v486_v38 }
 0x121   :  { %v1147_v32 = vadd.f32 %v2183_v12, %v1076_v17  ;;  %v739_v22 = vadd.f32 %v738_v28, %v737_v2  ;;  %v942_v53 = vadd.f32 %v941_v25, %v940_v3  ;;  %v1075_v44 = vmul.f32 %v2177_v9, %v486_v38  ;;  %v2411_v29 = vpop.f32.mrb[32].mxu0 }
 0x122   :  { %v1291_v52 = vsel %vm694_vm2, %v1208_v26, 0.0  ;;  %v943_v50 = vsel %vm694_vm2, %v858_v5, 0.0  ;;  %v501_v60 = vadd.f32 %v2345_v45, %v2172_v7  ;;  %v496_v30 = vadd.f32 %v2172_v7, %v2349_v0  ;;  %v2419_v21 = vpop.f32.mrb[33].mxu0 }
 0x123   :  { %v1292_v42 = vadd.f32 %v1291_v52, %v1290_v57  ;;  %v1211_v37 = vmax.f32 %v1147_v32, 0.0  ;;  %v944_v47 = vadd.f32 %v943_v50, %v942_v53  ;;  %v1146_v25 = vadd.f32 %v2183_v12, %v1075_v44 }
 0x124   :  { %v744_v38 = vsel %vm694_vm2, %v501_v60, 0.0  ;;  %v861_v3 = vmul.f32 %v501_v60, %v501_v60  ;;  %v1078_v17 = vmul.f32 %v2177_v9, %v501_v60  ;;  %v741_v2 = vadd.f32 %v740_v27, %v739_v22 }
 0x125   :  { %v1297_v26 = vsel %vm694_vm2, %v1211_v37, 0.0  ;;  %v1210_v28 = vmax.f32 %v1146_v25, 0.0  ;;  %v1294_v45 = vadd.f32 %v1293_v13, %v1292_v42  ;;  %v742_v5 = vsel %vm694_vm2, %v496_v30, 0.0 }
 0x126   :  { %v949_v0 = vsel %vm694_vm2, %v861_v3, 0.0  ;;  %v1149_v57 = vadd.f32 %v2183_v12, %v1078_v17  ;;  %v743_v32 = vadd.f32 %v742_v5, %v741_v2  ;;  %v860_v53 = vmul.f32 %v496_v30, %v496_v30 }
 0x127   :  { %v1295_v44 = vsel %vm694_vm2, %v1210_v28, 0.0  ;;  %v946_v52 = vadd.f32 %v945_v41, %v944_v47  ;;  %v1077_v50 = vmul.f32 %v2177_v9, %v496_v30  ;;  %v511_v27 = vadd.f32 %v2361_v62, %v2172_v7 }
 0x128   :  { %v1296_v22 = vadd.f32 %v1295_v44, %v1294_v45  ;;  %v1213_v60 = vmax.f32 %v1149_v57, 0.0  ;;  %v947_v13 = vsel %vm694_vm2, %v860_v53, 0.0  ;;  %v506_v42 = vadd.f32 %v2172_v7, %v2365_v54 }
 0x129   :  { %v948_v37 = vadd.f32 %v947_v13, %v946_v52  ;;  %v1148_v25 = vadd.f32 %v2183_v12, %v1077_v50  ;;  %v748_v3 = vsel %vm694_vm2, %v511_v27, 0.0  ;;  %v863_v17 = vmul.f32 %v511_v27, %v511_v27 }
 0x12a   :  { %v1301_v41 = vsel %vm694_vm2, %v1213_v60, 0.0  ;;  %v1298_v47 = vadd.f32 %v1297_v26, %v1296_v22  ;;  %v1080_v30 = vmul.f32 %v2177_v9, %v511_v27  ;;  %v745_v2 = vadd.f32 %v744_v38, %v743_v32 }
 0x12b   :  { %v1212_v62 = vmax.f32 %v1148_v25, 0.0  ;;  %v953_v28 = vsel %vm694_vm2, %v863_v17, 0.0  ;;  %v746_v45 = vsel %vm694_vm2, %v506_v42, 0.0  ;;  %v862_v5 = vmul.f32 %v506_v42, %v506_v42 }
 0x12c   :  { %v1151_v54 = vadd.f32 %v2183_v12, %v1080_v30  ;;  %v747_v57 = vadd.f32 %v746_v45, %v745_v2  ;;  %v950_v53 = vadd.f32 %v949_v0, %v948_v37  ;;  %v1079_v44 = vmul.f32 %v2177_v9, %v506_v42 }
 0x12d   :  { %v1299_v52 = vsel %vm694_vm2, %v1212_v62, 0.0  ;;  %v951_v50 = vsel %vm694_vm2, %v862_v5, 0.0  ;;  %v521_v26 = vadd.f32 %v2380_v15, %v2172_v7  ;;  %v516_v38 = vadd.f32 %v2172_v7, %v2384_v23 }
 0x12e   :  { %v1300_v32 = vadd.f32 %v1299_v52, %v1298_v47  ;;  %v1215_v27 = vmax.f32 %v1151_v54, 0.0  ;;  %v952_v22 = vadd.f32 %v951_v50, %v950_v53  ;;  %v1150_v60 = vadd.f32 %v2183_v12, %v1079_v44 }
 0x12f   :  { %v752_v13 = vsel %vm694_vm2, %v521_v26, 0.0  ;;  %v865_v0 = vmul.f32 %v521_v26, %v521_v26  ;;  %v1082_v42 = vmul.f32 %v2177_v9, %v521_v26  ;;  %v749_v37 = vadd.f32 %v748_v3, %v747_v57 }
 0x130   :  { %v1305_v25 = vsel %vm694_vm2, %v1215_v27, 0.0  ;;  %v1214_v17 = vmax.f32 %v1150_v60, 0.0  ;;  %v1302_v30 = vadd.f32 %v1301_v41, %v1300_v32  ;;  %v750_v15 = vsel %vm694_vm2, %v516_v38, 0.0 }
 0x131   :  { %v957_v2 = vsel %vm694_vm2, %v865_v0, 0.0  ;;  %v1153_v23 = vadd.f32 %v2183_v12, %v1082_v42  ;;  %v751_v47 = vadd.f32 %v750_v15, %v749_v37  ;;  %v864_v62 = vmul.f32 %v516_v38, %v516_v38 }
 0x132   :  { %v1303_v45 = vsel %vm694_vm2, %v1214_v17, 0.0  ;;  %v954_v5 = vadd.f32 %v953_v28, %v952_v22  ;;  %v1081_v54 = vmul.f32 %v2177_v9, %v516_v38  ;;  %v531_v3 = vadd.f32 %v2399_v63, %v2172_v7 }
 0x133   :  { %v1304_v57 = vadd.f32 %v1303_v45, %v1302_v30  ;;  %v1217_v53 = vmax.f32 %v1153_v23, 0.0  ;;  %v955_v41 = vsel %vm694_vm2, %v864_v62, 0.0  ;;  %v526_v44 = vadd.f32 %v2172_v7, %v2403_v58 }
 0x134   :  { %v956_v52 = vadd.f32 %v955_v41, %v954_v5  ;;  %v1152_v50 = vadd.f32 %v2183_v12, %v1081_v54  ;;  %v756_v26 = vsel %vm694_vm2, %v531_v3, 0.0  ;;  %v867_v32 = vmul.f32 %v531_v3, %v531_v3 }
 0x135   :  { %v1309_v28 = vsel %vm694_vm2, %v1217_v53, 0.0  ;;  %v1306_v27 = vadd.f32 %v1305_v25, %v1304_v57  ;;  %v1084_v38 = vmul.f32 %v2177_v9, %v531_v3  ;;  %v753_v22 = vadd.f32 %v752_v13, %v751_v47 }
 0x136   :  { %v1216_v63 = vmax.f32 %v1152_v50, 0.0  ;;  %v961_v60 = vsel %vm694_vm2, %v867_v32, 0.0  ;;  %v754_v0 = vsel %vm694_vm2, %v526_v44, 0.0  ;;  %v866_v42 = vmul.f32 %v526_v44, %v526_v44 }
 0x137   :  { %v1155_v58 = vadd.f32 %v2183_v12, %v1084_v38  ;;  %v755_v37 = vadd.f32 %v754_v0, %v753_v22  ;;  %v958_v17 = vadd.f32 %v957_v2, %v956_v52  ;;  %v1083_v30 = vmul.f32 %v2177_v9, %v526_v44 }
 0x138   :  { %v1307_v15 = vsel %vm694_vm2, %v1216_v63, 0.0  ;;  %v959_v23 = vsel %vm694_vm2, %v866_v42, 0.0  ;;  %v541_v25 = vadd.f32 %v2411_v29, %v2172_v7  ;;  %v536_v13 = vadd.f32 %v2172_v7, %v2419_v21 }
 0x139   :  { %v1308_v47 = vadd.f32 %v1307_v15, %v1306_v27  ;;  %v1219_v62 = vmax.f32 %v1155_v58, 0.0  ;;  %v757_v45 = vadd.f32 %v756_v26, %v755_v37  ;;  %v960_v5 = vadd.f32 %v959_v23, %v958_v17 }
 0x13a   :  { %v1154_v54 = vadd.f32 %v2183_v12, %v1083_v30  ;;  %v765_v2 = vsel %vm694_vm2, %v541_v25, 0.0  ;;  %v869_v3 = vmul.f32 %v541_v25, %v541_v25  ;;  %v1086_v57 = vmul.f32 %v2177_v9, %v541_v25 }
 0x13b   :  { %v758_v53 = vrot.slane %v757_v45, 4  ;;  %v962_v41 = vadd.f32 %v961_v60, %v960_v5  ;;  %v1310_v44 = vadd.f32 %v1309_v28, %v1308_v47  ;;  %v551_v29 = vadd.f32 %v2186_v14, %v2172_v7 }
 0x13c   :  { %v1218_v52 = vmax.f32 %v1154_v54, 0.0  ;;  %v1157_v21 = vadd.f32 %v2183_v12, %v1086_v57  ;;  %v764_v50 = vsel %vm694_vm2, %v536_v13, 0.0  ;;  %v546_v26 = vadd.f32 %v2172_v7, %v2190_v18 }
 0x13d   :  { %v963_v32 = vrot.slane %v962_v41, 4  ;;  %v970_v27 = vsel %vm694_vm2, %v869_v3, 0.0  ;;  %v766_v38 = vadd.f32 %v765_v2, %v764_v50  ;;  %v868_v22 = vmul.f32 %v536_v13, %v536_v13 }
 0x13e   :  { %v1313_v63 = vsel %vm694_vm2, %v1219_v62, 0.0  ;;  %v1311_v28 = vsel %vm694_vm2, %v1218_v52, 0.0  ;;  %v1221_v60 = vmax.f32 %v1157_v21, 0.0  ;;  %v1085_v14 = vmul.f32 %v2177_v9, %v536_v13 }
 0x13f   :  { %v2490_v0 = vadd.f32 %v758_v53, %v757_v45  ;;  %v964_v42 = vadd.f32 %v963_v32, %v962_v41  ;;  %v1312_v58 = vadd.f32 %v1311_v28, %v1310_v44  ;;  %v969_v37 = vsel %vm694_vm2, %v868_v22, 0.0 }
 0x140   :  { %v1322_v18 = vsel %vm694_vm2, %v1221_v60, 0.0  ;;  %v971_v17 = vadd.f32 %v970_v27, %v969_v37  ;;  %v1156_v30 = vadd.f32 %v2183_v12, %v1085_v14  ;;  %v871_v15 = vmul.f32 %v551_v29, %v551_v29 }
 0x141   :  { %v965_v23 = vrot.slane %v964_v42, 2  ;;  %v2495_v25 = vadd.f32 %v1313_v63, %v1312_v58  ;;  %v1088_v47 = vmul.f32 %v2177_v9, %v551_v29  ;;  %v767_v62 = vsel %vm694_vm2, %v546_v26, 0.0 }
 0x142   :  { %v1220_v13 = vmax.f32 %v1156_v30, 0.0  ;;  %v768_v45 = vadd.f32 %v767_v62, %v766_v38  ;;  %v870_v5 = vmul.f32 %v546_v26, %v546_v26  ;;  %v1087_v54 = vmul.f32 %v2177_v9, %v546_v26 }
 0x143   :  { %v769_v2 = vsel %vm694_vm2, %v551_v29, 0.0  ;;  %v1159_v3 = vadd.f32 %v2183_v12, %v1088_v47  ;;  %v561_v57 = vadd.f32 %v2200_v31, %v2172_v7  ;;  %v556_v52 = vadd.f32 %v2172_v7, %v2203_v36 }
 0x144   :  { %v1321_v53 = vsel %vm694_vm2, %v1220_v13, 0.0  ;;  %v972_v41 = vsel %vm694_vm2, %v870_v5, 0.0  ;;  %v1158_v44 = vadd.f32 %v2183_v12, %v1087_v54  ;;  %v760_v21 = vrot.slane %v2490_v0, 2 }
 0x145   :  { %v1323_v50 = vadd.f32 %v1322_v18, %v1321_v53  ;;  %v1223_v26 = vmax.f32 %v1159_v3, 0.0  ;;  %v973_v32 = vadd.f32 %v972_v41, %v971_v17  ;;  %v2510_v29 = vadd.f32 %v965_v23, %v964_v42 }
 0x146   :  { %v974_v27 = vsel %vm694_vm2, %v871_v15, 0.0  ;;  %v1222_v38 = vmax.f32 %v1158_v44, 0.0  ;;  %v1090_v31 = vmul.f32 %v2177_v9, %v561_v57  ;;  %v773_v22 = vsel %vm694_vm2, %v561_v57, 0.0 }
 0x147   :  { %v873_v63 = vmul.f32 %v561_v57, %v561_v57  ;;  %v770_v28 = vadd.f32 %v769_v2, %v768_v45  ;;  %v771_v60 = vsel %vm694_vm2, %v556_v52, 0.0  ;;  %v1326_v36 = vsel %vm694_vm2, %v1223_v26, 0.0 }
 0x148   :  { %v1324_v14 = vsel %vm694_vm2, %v1222_v38, 0.0  ;;  %v1161_v58 = vadd.f32 %v2183_v12, %v1090_v31  ;;  %v872_v37 = vmul.f32 %v556_v52, %v556_v52  ;;  %v975_v17 = vadd.f32 %v974_v27, %v973_v32 }
 0x149   :  { %v1325_v42 = vadd.f32 %v1324_v14, %v1323_v50  ;;  %v772_v18 = vadd.f32 %v771_v60, %v770_v28  ;;  %v1089_v30 = vmul.f32 %v2177_v9, %v556_v52  ;;  %v571_v47 = vadd.f32 %v2214_v51, %v2172_v7 }
 0x14a   :  { %v1225_v15 = vmax.f32 %v1161_v58, 0.0  ;;  %v976_v23 = vsel %vm694_vm2, %v872_v37, 0.0  ;;  %v566_v62 = vadd.f32 %v2172_v7, %v2218_v56  ;;  %v978_v2 = vsel %vm694_vm2, %v873_v63, 0.0 }
 0x14b   :  { %v977_v13 = vadd.f32 %v976_v23, %v975_v17  ;;  %v1160_v45 = vadd.f32 %v2183_v12, %v1089_v30  ;;  %v1327_v5 = vadd.f32 %v1326_v36, %v1325_v42  ;;  %v774_v54 = vadd.f32 %v773_v22, %v772_v18 }
 0x14c   :  { %v1330_v3 = vsel %vm694_vm2, %v1225_v15, 0.0  ;;  %v875_v57 = vmul.f32 %v571_v47, %v571_v47  ;;  %v1092_v53 = vmul.f32 %v2177_v9, %v571_v47  ;;  %v775_v44 = vsel %vm694_vm2, %v566_v62, 0.0 }
 0x14d   :  { %v1224_v41 = vmax.f32 %v1160_v45, 0.0  ;;  %v874_v52 = vmul.f32 %v566_v62, %v566_v62  ;;  %v979_v51 = vadd.f32 %v978_v2, %v977_v13  ;;  %v777_v50 = vsel %vm694_vm2, %v571_v47, 0.0  ;;  %v2550_v13 = vld [vmem:[%s2773_s3] ss:$0 sm:$0xff] }
 0x14e   :  { %v1163_v56 = vadd.f32 %v2183_v12, %v1092_v53  ;;  %v776_v26 = vadd.f32 %v775_v44, %v774_v54  ;;  %v1091_v32 = vmul.f32 %v2177_v9, %v566_v62  ;;  %v581_v31 = vadd.f32 %v2226_v8, %v2172_v7  ;;  %v2556_v45 = vld [vmem:[%s2772_s2] ss:$0 sm:$0xff] }
 0x14f   :  { %v1328_v27 = vsel %vm694_vm2, %v1224_v41, 0.0  ;;  %v980_v38 = vsel %vm694_vm2, %v874_v52, 0.0  ;;  %v576_v22 = vadd.f32 %v2172_v7, %v2231_v16  ;;  %v982_v14 = vsel %vm694_vm2, %v875_v57, 0.0  ;;  %v2567_v41 = vld [vmem:[%s2774_s4] ss:$0 sm:$0xff] }
 0x150   :  { %v1329_v63 = vadd.f32 %v1328_v27, %v1327_v5  ;;  %v1227_v28 = vmax.f32 %v1163_v56, 0.0  ;;  %v981_v60 = vadd.f32 %v980_v38, %v979_v51  ;;  %v1162_v36 = vadd.f32 %v2183_v12, %v1091_v32 }
 0x151   :  { %v781_v58 = vsel %vm694_vm2, %v581_v31, 0.0  ;;  %v1094_v37 = vmul.f32 %v2177_v9, %v581_v31  ;;  %v778_v42 = vadd.f32 %v777_v50, %v776_v26  ;;  %v877_v30 = vmul.f32 %v581_v31, %v581_v31 }
 0x152   :  { %v1226_v18 = vmax.f32 %v1162_v36, 0.0  ;;  %v1331_v17 = vadd.f32 %v1330_v3, %v1329_v63  ;;  %v779_v8 = vsel %vm694_vm2, %v576_v22, 0.0  ;;  %v1334_v15 = vsel %vm694_vm2, %v1227_v28, 0.0 }
 0x153   :  { %v1165_v7 = vadd.f32 %v2183_v12, %v1094_v37  ;;  %v780_v16 = vadd.f32 %v779_v8, %v778_v42  ;;  %v876_v23 = vmul.f32 %v576_v22, %v576_v22  ;;  %v983_v62 = vadd.f32 %v982_v14, %v981_v60 }
 0x154   :  { %v1332_v47 = vsel %vm694_vm2, %v1226_v18, 0.0  ;;  %v1093_v9 = vmul.f32 %v2550_v13, %v576_v22  ;;  %v591_v12 = vadd.f32 %v2556_v45, %v2239_v33  ;;  %v586_v3 = vadd.f32 %v2556_v45, %v2243_v39 }
 0x155   :  { %v1333_v5 = vadd.f32 %v1332_v47, %v1331_v17  ;;  %v1229_v54 = vmax.f32 %v1165_v7, 0.0  ;;  %v984_v2 = vsel %vm694_vm2, %v876_v23, 0.0  ;;  %v986_v57 = vsel %vm694_vm2, %v877_v30, 0.0 }
 0x156   :  { %v985_v53 = vadd.f32 %v984_v2, %v983_v62  ;;  %v1164_v44 = vadd.f32 %v2567_v41, %v1093_v9  ;;  %v785_v52 = vsel %vm694_vm2, %v591_v12, 0.0  ;;  %v879_v51 = vmul.f32 %v591_v12, %v591_v12 }
 0x157   :  { %v1335_v33 = vadd.f32 %v1334_v15, %v1333_v5  ;;  %v1096_v50 = vmul.f32 %v2550_v13, %v591_v12  ;;  %v782_v56 = vadd.f32 %v781_v58, %v780_v16  ;;  %v1338_v26 = vsel %vm694_vm2, %v1229_v54, 0.0 }
 0x158   :  { %v1228_v39 = vmax.f32 %v1164_v44, 0.0  ;;  %v783_v32 = vsel %vm694_vm2, %v586_v3, 0.0  ;;  %v878_v27 = vmul.f32 %v586_v3, %v586_v3  ;;  %v987_v22 = vadd.f32 %v986_v57, %v985_v53 }
 0x159   :  { %v1167_v38 = vadd.f32 %v2567_v41, %v1096_v50  ;;  %v784_v31 = vadd.f32 %v783_v32, %v782_v56  ;;  %v1095_v63 = vmul.f32 %v2550_v13, %v586_v3  ;;  %v601_v36 = vadd.f32 %v2556_v45, %v2252_v55 }
 0x15a   :  { %v1336_v28 = vsel %vm694_vm2, %v1228_v39, 0.0  ;;  %v988_v60 = vsel %vm694_vm2, %v878_v27, 0.0  ;;  %v596_v14 = vadd.f32 %v2556_v45, %v2256_v61  ;;  %v990_v17 = vsel %vm694_vm2, %v879_v51, 0.0 }
 0x15b   :  { %v1337_v58 = vadd.f32 %v1336_v28, %v1335_v33  ;;  %v1231_v37 = vmax.f32 %v1167_v38, 0.0  ;;  %v989_v42 = vadd.f32 %v988_v60, %v987_v22  ;;  %v1166_v18 = vadd.f32 %v2567_v41, %v1095_v63 }
 0x15c   :  { %v789_v30 = vsel %vm694_vm2, %v601_v36, 0.0  ;;  %v1098_v8 = vmul.f32 %v2550_v13, %v601_v36  ;;  %v786_v15 = vadd.f32 %v785_v52, %v784_v31  ;;  %v881_v23 = vmul.f32 %v601_v36, %v601_v36 }
 0x15d   :  { %v1230_v7 = vmax.f32 %v1166_v18, 0.0  ;;  %v1339_v16 = vadd.f32 %v1338_v26, %v1337_v58  ;;  %v787_v55 = vsel %vm694_vm2, %v596_v14, 0.0  ;;  %v1342_v47 = vsel %vm694_vm2, %v1231_v37, 0.0 }
 0x15e   :  { %v1169_v61 = vadd.f32 %v2567_v41, %v1098_v8  ;;  %v788_v62 = vadd.f32 %v787_v55, %v786_v15  ;;  %v880_v9 = vmul.f32 %v596_v14, %v596_v14  ;;  %v991_v5 = vadd.f32 %v990_v17, %v989_v42 }
 0x15f   :  { %v1340_v12 = vsel %vm694_vm2, %v1230_v7, 0.0  ;;  %v1097_v54 = vmul.f32 %v2550_v13, %v596_v14  ;;  %v611_v2 = vadd.f32 %v2556_v45, %v2265_v19  ;;  %v606_v44 = vadd.f32 %v2556_v45, %v2269_v24  ;;  %v1392_v19 = vld [vmem:[%s2775_s5] sm:$0xff]  ;;  %v1393_v24 = vld [vmem:[%s2775_s5 + $0x8] sm:$0xff] }
 0x160   :  { %v1341_v3 = vadd.f32 %v1340_v12, %v1339_v16  ;;  %v1233_v57 = vmax.f32 %v1169_v61, 0.0  ;;  %v992_v53 = vsel %vm694_vm2, %v880_v9, 0.0  ;;  %v994_v52 = vsel %vm694_vm2, %v881_v23, 0.0 }
 0x161   :  { %v993_v33 = vadd.f32 %v992_v53, %v991_v5  ;;  %v1168_v51 = vadd.f32 %v2567_v41, %v1097_v54  ;;  %v793_v50 = vsel %vm694_vm2, %v611_v2, 0.0  ;;  %v883_v26 = vmul.f32 %v611_v2, %v611_v2 }
 0x162   :  { %v1343_v56 = vadd.f32 %v1342_v47, %v1341_v3  ;;  %v1100_v39 = vmul.f32 %v2550_v13, %v611_v2  ;;  %v790_v32 = vadd.f32 %v789_v30, %v788_v62  ;;  %v1346_v27 = vsel %vm694_vm2, %v1233_v57, 0.0 }
 0x163   :  { %v1232_v38 = vmax.f32 %v1168_v51, 0.0  ;;  %v791_v31 = vsel %vm694_vm2, %v606_v44, 0.0  ;;  %v882_v22 = vmul.f32 %v606_v44, %v606_v44  ;;  %v995_v60 = vadd.f32 %v994_v52, %v993_v33 }
 0x164   :  { %v1171_v63 = vadd.f32 %v2567_v41, %v1100_v39  ;;  %v792_v28 = vadd.f32 %v791_v31, %v790_v32  ;;  %v1099_v36 = vmul.f32 %v2550_v13, %v606_v44  ;;  %v1797_v37 = vpack.c.bf16 %v1393_v24, %v1392_v19 }
 0x165   :  { %v1344_v14 = vsel %vm694_vm2, %v1232_v38, 0.0  ;;  %v996_v58 = vsel %vm694_vm2, %v882_v22, 0.0  ;;  %v998_v18 = vsel %vm694_vm2, %v883_v26, 0.0  ;;  %v1839_v8 = vmov 0.0|0.0  }
 0x166   :  { %v1345_v42 = vadd.f32 %v1344_v14, %v1343_v56  ;;  %v997_v17 = vadd.f32 %v996_v58, %v995_v60  ;;  %v1170_v30 = vadd.f32 %v2567_v41, %v1099_v36  ;;  %1796 = vmatprep.subr.bf16.mxu1 %v1839_v8  ;;  %v1235_v15 = vmax.f32 %v1171_v63, 0.0 }
 0x167   :  { %1798 = vmatpush3.bf16.msra.mxu1 %v1797_v37  ;;  %v621_v7 = vadd.f32 %v2556_v45, %v2277_v43  ;;  %v616_v16 = vadd.f32 %v2556_v45, %v2281_v49  ;;  %v794_v23 = vadd.f32 %v793_v50, %v792_v28  ;;  %v631_v62 = vadd.f32 %v2556_v45, %v2290_v4 }
 0x168   :  { %v1234_v55 = vmax.f32 %v1170_v30, 0.0  ;;  %v1347_v47 = vadd.f32 %v1346_v27, %v1345_v42  ;;  %v999_v61 = vadd.f32 %v998_v18, %v997_v17  ;;  %1799 = vmatprep.subr.bf16.mxu1 %v1839_v8  ;;  %v1315_v9 = vrot.slane %v2495_v25, 4 }
 0x169   :  { %v885_v12 = vmul.f32 %v621_v7, %v621_v7  ;;  %v1102_v5 = vmul.f32 %v2550_v13, %v621_v7  ;;  %v795_v54 = vsel %vm694_vm2, %v616_v16, 0.0  ;;  %v884_v3 = vmul.f32 %v616_v16, %v616_v16 }
 0x16a   :  { %v1348_v43 = vsel %vm694_vm2, %v1234_v55, 0.0  ;;  %v796_v2 = vadd.f32 %v795_v54, %v794_v23  ;;  %v1101_v49 = vmul.f32 %v2550_v13, %v616_v16  ;;  %v1350_v57 = vsel %vm694_vm2, %v1235_v15, 0.0 }
 0x16b   :  { %v1349_v53 = vadd.f32 %v1348_v43, %v1347_v47  ;;  %v797_v44 = vsel %vm694_vm2, %v621_v7, 0.0  ;;  %v1173_v4 = vadd.f32 %v2567_v41, %v1102_v5  ;;  %v1002_v52 = vsel %vm694_vm2, %v885_v12, 0.0 }
 0x16c   :  { %v1000_v33 = vsel %vm694_vm2, %v884_v3, 0.0  ;;  %v1172_v51 = vadd.f32 %v2567_v41, %v1101_v49  ;;  %v1104_v50 = vmul.f32 %v2550_v13, %v631_v62  ;;  %v801_v39 = vsel %vm694_vm2, %v631_v62, 0.0 }
 0x16d   :  { %v1001_v56 = vadd.f32 %v1000_v33, %v999_v61  ;;  %v1351_v26 = vadd.f32 %v1350_v57, %v1349_v53  ;;  %v626_v32 = vadd.f32 %v2556_v45, %v2294_v11  ;;  %v1237_v19 = vmax.f32 %v1173_v4, 0.0 }
 0x16e   :  { %v1236_v24 = vmax.f32 %v1172_v51, 0.0  ;;  %v1175_v27 = vadd.f32 %v2567_v41, %v1104_v50  ;;  %v798_v38 = vadd.f32 %v797_v44, %v796_v2  ;;  %v887_v31 = vmul.f32 %v631_v62, %v631_v62 }
 0x16f   :  { %v799_v22 = vsel %vm694_vm2, %v626_v32, 0.0  ;;  %v886_v63 = vmul.f32 %v626_v32, %v626_v32  ;;  %v1003_v28 = vadd.f32 %v1002_v52, %v1001_v56  ;;  %v1103_v58 = vmul.f32 %v2550_v13, %v626_v32 }
 0x170   :  { %v1352_v60 = vsel %vm694_vm2, %v1236_v24, 0.0  ;;  %v1239_v36 = vmax.f32 %v1175_v27, 0.0  ;;  %v800_v14 = vadd.f32 %v799_v22, %v798_v38  ;;  %v641_v11 = vadd.f32 %v2556_v45, %v2303_v35 }
 0x171   :  { %v1353_v37 = vadd.f32 %v1352_v60, %v1351_v26  ;;  %v1004_v42 = vsel %vm694_vm2, %v886_v63, 0.0  ;;  %v636_v18 = vadd.f32 %v2556_v45, %v2307_v40  ;;  %v1354_v17 = vsel %vm694_vm2, %v1237_v19, 0.0 }
 0x172   :  { %v1005_v30 = vadd.f32 %v1004_v42, %v1003_v28  ;;  %v1174_v8 = vadd.f32 %v2567_v41, %v1103_v58  ;;  %v802_v15 = vadd.f32 %v801_v39, %v800_v14  ;;  %v1006_v7 = vsel %vm694_vm2, %v887_v31, 0.0 }
 0x173   :  { %v1355_v16 = vadd.f32 %v1354_v17, %v1353_v37  ;;  %v889_v23 = vmul.f32 %v641_v11, %v641_v11  ;;  %v1106_v55 = vmul.f32 %v2550_v13, %v641_v11  ;;  %v803_v61 = vsel %vm694_vm2, %v636_v18, 0.0 }
 0x174   :  { %v1238_v47 = vmax.f32 %v1174_v8, 0.0  ;;  %v888_v62 = vmul.f32 %v636_v18, %v636_v18  ;;  %v1007_v35 = vadd.f32 %v1006_v7, %v1005_v30  ;;  %v1358_v12 = vsel %vm694_vm2, %v1239_v36, 0.0 }
 0x175   :  { %v1177_v40 = vadd.f32 %v2567_v41, %v1106_v55  ;;  %v804_v5 = vadd.f32 %v803_v61, %v802_v15  ;;  %v1105_v54 = vmul.f32 %v2550_v13, %v636_v18  ;;  %v651_v3 = vadd.f32 %v2556_v45, %v2319_v1 }
 0x176   :  { %v1356_v43 = vsel %vm694_vm2, %v1238_v47, 0.0  ;;  %v1008_v2 = vsel %vm694_vm2, %v888_v62, 0.0  ;;  %v646_v49 = vadd.f32 %v2556_v45, %v2325_v6  ;;  %v805_v53 = vsel %vm694_vm2, %v641_v11, 0.0 }
 0x177   :  { %v1357_v57 = vadd.f32 %v1356_v43, %v1355_v16  ;;  %v1009_v44 = vadd.f32 %v1008_v2, %v1007_v35  ;;  %v1176_v4 = vadd.f32 %v2567_v41, %v1105_v54  ;;  %v1010_v52 = vsel %vm694_vm2, %v889_v23, 0.0 }
 0x178   :  { %v1241_v33 = vmax.f32 %v1177_v40, 0.0  ;;  %v1108_v51 = vmul.f32 %v2550_v13, %v651_v3  ;;  %v806_v50 = vadd.f32 %v805_v53, %v804_v5  ;;  %v891_v39 = vmul.f32 %v651_v3, %v651_v3 }
 0x179   :  { %v1240_v56 = vmax.f32 %v1176_v4, 0.0  ;;  %v1359_v26 = vadd.f32 %v1358_v12, %v1357_v57  ;;  %v807_v1 = vsel %vm694_vm2, %v646_v49, 0.0  ;;  %v809_v32 = vsel %vm694_vm2, %v651_v3, 0.0 }
 0x17a   :  { %v1179_v6 = vadd.f32 %v2567_v41, %v1108_v51  ;;  %v808_v19 = vadd.f32 %v807_v1, %v806_v50  ;;  %v890_v24 = vmul.f32 %v646_v49, %v646_v49  ;;  %v1011_v38 = vadd.f32 %v1010_v52, %v1009_v44 }
 0x17b   :  { %v1360_v27 = vsel %vm694_vm2, %v1240_v56, 0.0  ;;  %v1107_v31 = vmul.f32 %v2550_v13, %v646_v49  ;;  %v661_v22 = vadd.f32 %v2556_v45, %v2336_v34  ;;  %v1362_v63 = vsel %vm694_vm2, %v1241_v33, 0.0 }
 0x17c   :  { %v1361_v28 = vadd.f32 %v1360_v27, %v1359_v26  ;;  %v1012_v60 = vsel %vm694_vm2, %v890_v24, 0.0  ;;  %v656_v36 = vadd.f32 %v2556_v45, %v2340_v46  ;;  %v1014_v14 = vsel %vm694_vm2, %v891_v39, 0.0 }
 0x17d   :  { %v1243_v58 = vmax.f32 %v1179_v6, 0.0  ;;  %v1013_v37 = vadd.f32 %v1012_v60, %v1011_v38  ;;  %v1178_v42 = vadd.f32 %v2567_v41, %v1107_v31  ;;  %v813_v18 = vsel %vm694_vm2, %v661_v22, 0.0 }
 0x17e   :  { %v1363_v11 = vadd.f32 %v1362_v63, %v1361_v28  ;;  %v1110_v17 = vmul.f32 %v2550_v13, %v661_v22  ;;  %v810_v34 = vadd.f32 %v809_v32, %v808_v19  ;;  %v893_v8 = vmul.f32 %v661_v22, %v661_v22 }
 0x17f   :  { %v1242_v30 = vmax.f32 %v1178_v42, 0.0  ;;  %v811_v15 = vsel %vm694_vm2, %v656_v36, 0.0  ;;  %v892_v7 = vmul.f32 %v656_v36, %v656_v36  ;;  %v1015_v23 = vadd.f32 %v1014_v14, %v1013_v37 }
 0x180   :  { %v1181_v16 = vadd.f32 %v2567_v41, %v1110_v17  ;;  %v812_v46 = vadd.f32 %v811_v15, %v810_v34  ;;  %v1109_v55 = vmul.f32 %v2550_v13, %v656_v36  ;;  %v671_v62 = vadd.f32 %v2556_v45, %v2353_v10  ;;  %v2783_v17 = vld [vmem:[#allocation6_spill] sm:$0xff] }
 0x181   :  { %v1364_v47 = vsel %vm694_vm2, %v1242_v30, 0.0  ;;  %v1016_v61 = vsel %vm694_vm2, %v892_v7, 0.0  ;;  %v666_v35 = vadd.f32 %v2556_v45, %v2357_v20  ;;  %v1366_v12 = vsel %vm694_vm2, %v1243_v58, 0.0  ;;  %v2784_v30 = vld [vmem:[#allocation7_spill] sm:$0xff] }
 0x182   :  { %v1365_v40 = vadd.f32 %v1364_v47, %v1363_v11  ;;  %v1017_v5 = vadd.f32 %v1016_v61, %v1015_v23  ;;  %v1180_v54 = vadd.f32 %v2567_v41, %v1109_v55  ;;  %v1018_v43 = vsel %vm694_vm2, %v893_v8, 0.0 }
 0x183   :  { %v1245_v2 = vmax.f32 %v1181_v16, 0.0  ;;  %v1112_v3 = vmul.f32 %v2550_v13, %v671_v62  ;;  %v814_v49 = vadd.f32 %v813_v18, %v812_v46  ;;  %v895_v44 = vmul.f32 %v671_v62, %v671_v62 }
 0x184   :  { %v1244_v57 = vmax.f32 %v1180_v54, 0.0  ;;  %v1367_v53 = vadd.f32 %v1366_v12, %v1365_v40  ;;  %v815_v10 = vsel %vm694_vm2, %v666_v35, 0.0  ;;  %v817_v4 = vsel %vm694_vm2, %v671_v62, 0.0  ;;  %v1394_v62 = vld [vmem:[%s2775_s5 + $0x10] sm:$0xff] }
 0x185   :  { %v1183_v20 = vadd.f32 %v2567_v41, %v1112_v3  ;;  %v816_v52 = vadd.f32 %v815_v10, %v814_v49  ;;  %v894_v33 = vmul.f32 %v666_v35, %v666_v35  ;;  %v1019_v50 = vadd.f32 %v1018_v43, %v1017_v5 }
 0x186   :  { %v1368_v51 = vsel %vm694_vm2, %v1244_v57, 0.0  ;;  %v1111_v56 = vmul.f32 %v2550_v13, %v666_v35  ;;  %v681_v26 = vadd.f32 %v2556_v45, %v2373_v48  ;;  %v1370_v39 = vsel %vm694_vm2, %v1245_v2, 0.0 }
 0x187   :  { %v1369_v1 = vadd.f32 %v1368_v51, %v1367_v53  ;;  %v1020_v32 = vsel %vm694_vm2, %v894_v33, 0.0  ;;  %v676_v6 = vadd.f32 %v2556_v45, %v2376_v59  ;;  %v1022_v19 = vsel %vm694_vm2, %v895_v44, 0.0 }
 0x188   :  { %v1247_v24 = vmax.f32 %v1183_v20, 0.0  ;;  %v1021_v27 = vadd.f32 %v1020_v32, %v1019_v50  ;;  %v1182_v38 = vadd.f32 %v2567_v41, %v1111_v56  ;;  %v821_v22 = vsel %vm694_vm2, %v681_v26, 0.0 }
 0x189   :  { %v1371_v31 = vadd.f32 %v1370_v39, %v1369_v1  ;;  %v1114_v63 = vmul.f32 %v2550_v13, %v681_v26  ;;  %v818_v48 = vadd.f32 %v817_v4, %v816_v52  ;;  %v897_v60 = vmul.f32 %v681_v26, %v681_v26 }
 0x18a   :  { %v1246_v28 = vmax.f32 %v1182_v38, 0.0  ;;  %v819_v36 = vsel %vm694_vm2, %v676_v6, 0.0  ;;  %v896_v14 = vmul.f32 %v676_v6, %v676_v6  ;;  %v1023_v37 = vadd.f32 %v1022_v19, %v1021_v27 }
 0x18b   :  { %v1185_v58 = vadd.f32 %v2567_v41, %v1114_v63  ;;  %v820_v59 = vadd.f32 %v819_v36, %v818_v48  ;;  %v1113_v42 = vmul.f32 %v2550_v13, %v676_v6  ;;  %v691_v34 = vadd.f32 %v2556_v45, %v2783_v17 }
 0x18c   :  { %v1372_v11 = vsel %vm694_vm2, %v1246_v28, 0.0  ;;  %v1024_v18 = vsel %vm694_vm2, %v896_v14, 0.0  ;;  %v686_v8 = vadd.f32 %v2556_v45, %v2784_v30  ;;  %v1374_v15 = vsel %vm694_vm2, %v1247_v24, 0.0  ;;  %v1395_v45 = vld [vmem:[%s2775_s5 + $0x18] sm:$0xff]  ;;  %v1481_v30 = vld [vmem:[%s2777_s7] sm:$0x3] }
 0x18d   :  { %v1373_v7 = vadd.f32 %v1372_v11, %v1371_v31  ;;  %v1025_v16 = vadd.f32 %v1024_v18, %v1023_v37  ;;  %v1184_v46 = vadd.f32 %v2567_v41, %v1113_v42  ;;  %v1026_v23 = vsel %vm694_vm2, %v897_v60, 0.0 }
 0x18e   :  { %v1249_v55 = vmax.f32 %v1185_v58, 0.0  ;;  %v1116_v47 = vmul.f32 %v2550_v13, %v691_v34  ;;  %v822_v61 = vadd.f32 %v821_v22, %v820_v59  ;;  %v825_v40 = vsel %vm694_vm2, %v691_v34, 0.0 }
 0x18f   :  { %v1248_v35 = vmax.f32 %v1184_v46, 0.0  ;;  %v1375_v12 = vadd.f32 %v1374_v15, %v1373_v7  ;;  %v823_v5 = vsel %vm694_vm2, %v686_v8, 0.0  ;;  %v899_v54 = vmul.f32 %v691_v34, %v691_v34 }
 0x190   :  { %v1187_v43 = vadd.f32 %v2567_v41, %v1116_v47  ;;  %v824_v2 = vadd.f32 %v823_v5, %v822_v61  ;;  %v898_v3 = vmul.f32 %v686_v8, %v686_v8  ;;  %v1027_v57 = vadd.f32 %v1026_v23, %v1025_v16 }
 0x191   :  { %v1376_v49 = vsel %vm694_vm2, %v1248_v35, 0.0  ;;  %v1115_v53 = vmul.f32 %v2550_v13, %v686_v8  ;;  %v1800_v44 = vpack.c.bf16 %v1395_v45, %v1394_v62  ;;  %v1378_v10 = vsel %vm694_vm2, %v1249_v55, 0.0 }
 0x192   :  { %v1377_v4 = vadd.f32 %v1376_v49, %v1375_v12  ;;  %v826_v20 = vadd.f32 %v825_v40, %v824_v2  ;;  %v1028_v52 = vsel %vm694_vm2, %v898_v3, 0.0  ;;  %v1316_v50 = vadd.f32 %v1315_v9, %v2495_v25 }
 0x193   :  { %v1029_v33 = vadd.f32 %v1028_v52, %v1027_v57  ;;  %v1186_v51 = vadd.f32 %v2567_v41, %v1115_v53  ;;  %1801 = vmatpush3.bf16.msra.mxu1 %v1800_v44  ;;  %v1030_v56 = vsel %vm694_vm2, %v899_v54, 0.0  ;;  %v1841_v13 = vmov 0.0  }
 0x194   :  { %v827_v26 = vrot.slane %v826_v20, 4  ;;  %v1379_v39 = vadd.f32 %v1378_v10, %v1377_v4  ;;  %1785 = vmatprep.mubr.msk.f32.mxu1 %vm1840_vm3, %v1841_v13  ;;  %v1251_v1 = vmax.f32 %v1187_v43, 0.0  ;;  %v761_v19 = vadd.f32 %v760_v21, %v2490_v0 }
 0x195   :  { %v1031_v32 = vadd.f32 %v1030_v56, %v1029_v33  ;;  %v1250_v6 = vmax.f32 %v1186_v51, 0.0  ;;  %v967_v24 = vrot.slane %v2510_v29, 1  ;;  %v1482_v38 = vlaneseq }
 0x196   :  { %v828_v41 = vadd.f32 %v827_v26, %v826_v20  ;;  %v762_v9 = vrot.slane %v761_v19, 1  ;;  %v1317_v31 = vrot.slane %v1316_v50, 2  ;;  %v1382_v28 = vsel %vm694_vm2, %v1251_v1, 0.0 }
 0x197   :  { %v1032_v27 = vrot.slane %v1031_v32, 4  ;;  %v1380_v25 = vsel %vm694_vm2, %v1250_v6, 0.0  ;;  %v968_v48 = vadd.f32 %v967_v24, %v2510_v29  ;;  %v1483_v14 = vshrl.u32 %v1482_v38, 7 }
 0x198   :  { %v829_v22 = vrot.slane %v828_v41, 2  ;;  %v1381_v63 = vadd.f32 %v1380_v25, %v1379_v39  ;;  %v763_v36 = vadd.f32 %v762_v9, %v761_v19  ;;  %v1318_v17 = vadd.f32 %v1317_v31, %v1316_v50 }
 0x199   :  { %v1033_v60 = vadd.f32 %v1032_v27, %v1031_v32  ;;  %v1038_v21 = vmul.f32 0.00390625, %v968_v48  ;;  %v1484_v42 = vsub.s32 0, %v1483_v14  ;;  %v1490_v11 = vsub.s32 1, %v1483_v14  ;;  %v1595_v32 = vld [vmem:[%s2776_s6] ss:$0 sm:$0xff] }
 0x19a   :  { %v830_v58 = vadd.f32 %v829_v22, %v828_v41  ;;  %v1383_v0 = vadd.f32 %v1382_v28, %v1381_v63  ;;  %v834_v37 = vmul.f32 0.00390625, %v763_v36  ;;  %v1319_v61 = vrot.slane %v1318_v17, 1 }
 0x19b   :  { %v1034_v59 = vrot.slane %v1033_v60, 2  ;;  %v1485_v23 = vrot.slane %v1481_v30, %v1484_v42  ;;  %v1491_v55 = vrot.slane %v1481_v30, %v1490_v11  ;;  %v1505_v39 = vstv %s2778_s8  ;;  %s1815_s8 = scalar_lea.vmem %s1516_s27, 32 }
 0x19c   :  { %v1384_v18 = vrot.slane %v1383_v0, 4  ;;  %v831_v34 = vrot.slane %v830_v58, 1  ;;  %v1040_v8 = vmul.f32 %v834_v37, %v834_v37  ;;  %v1320_v2 = vadd.f32 %v1319_v61, %v1318_v17  ;;  %p1816_p0 = scmp.ne.s32.totalorder %s1516_s27, %s1815_s8  ;;  %p1821_p2 = scmp.lt.s32.totalorder %s1815_s8, %s1815_s8 }
 0x19d   :  { %v1035_v29 = vadd.f32 %v1034_v59, %v1033_v60  ;;  %v1486_v54 = vmul.f32 %v1485_v23, %v834_v37 }
 0x19e   :  { %v1385_v15 = vadd.f32 %v1384_v18, %v1383_v0  ;;  %v832_v7 = vadd.f32 %v831_v34, %v830_v58  ;;  %v1042_v46 = vsub.f32 %v1038_v21, %v1040_v8  ;;  %v1390_v10 = vmul.f32 0.00390625, %v1320_v2  ;;  %p1822_p3 = por %p1821_p2, %p1820_p1 }
 0x19f   :  { %v1036_v16 = vrot.slane %v1035_v29, 1 }
 0x1a0   :  { %v1386_v47 = vrot.slane %v1385_v15, 2  ;;  %v835_v62 = vmul.f32 0.00390625, %v832_v7  ;;  %v1044_v35 = vmax.f32 %v1042_v46, 0.0  ;;  %p1823_p4 = pnand %p1822_p3, %p1816_p0 }
 0x1a1   :  { %v1037_v45 = vadd.f32 %v1036_v16, %v1035_v29 }
 0x1a2   :  { %v1387_v12 = vadd.f32 %v1386_v47, %v1385_v15  ;;  %v1041_v40 = vmul.f32 %v835_v62, %v835_v62  ;;  %v1492_v43 = vmul.f32 %v1491_v55, %v1044_v35  ;;  %v1487_v20 = vmul.f32 %v1485_v23, %v835_v62 }
 0x1a3   :  { %v1039_v5 = vmul.f32 0.00390625, %v1037_v45 }
 0x1a4   :  { %v1388_v3 = vrot.slane %v1387_v12, 1  ;;  %v1494_v57 = vadd.f32 %v1492_v43, %v1486_v54 }
 0x1a5   :  { %v1043_v49 = vsub.f32 %v1039_v5, %v1041_v40 }
 0x1a6   :  { %v1389_v53 = vadd.f32 %v1388_v3, %v1387_v12 }
 0x1a7   :  { %v1045_v44 = vmax.f32 %v1043_v49, 0.0 }
 0x1a8   :  { %v1391_v4 = vmul.f32 0.00390625, %v1389_v53 }
 0x1a9   :  { %v1493_v52 = vmul.f32 %v1491_v55, %v1045_v44 }
 0x1aa   :  { %v1406_v33 = vsel %vm1405_vm4, %v1391_v4, %v1390_v10 }
 0x1ab   :  { %1786 = vmatmul.mubr.msk.f32.vlgmr.msra.gmra.mrb[30].mxu1 %vm694_vm2, %v1406_v33  ;;  %v1495_v51 = vadd.f32 %v1493_v52, %v1487_v20 }
 0x1ad   :  { %v1498_v50 = vrot.slane %v1495_v51, 7 }
 0x1af   :  { %v1499_v56 = vsel %vm1405_vm4, %v1498_v50, %v1494_v57 }
 0x1b0   :  { %v1501_v26 = vsel %vm1479_vm5, %v1499_v56, 0.0 }
 0x1b1   :  { %1502 = vadd.xlane.f32.xlu0 %v1501_v26 }
 0x23e   :  { %v1503_v13 = vpop.xlane.xlu0 %1502 }
 0x23f   :  { %v1506_v1 = vadd.f32 %v1505_v39, %v1503_v13 }
 0x241   :  { %1508 = vst.msk [vmem:[%s2780_s10] sm:$0x3] %vm1507_vm6, %v1506_v1 }
 0x27e   :  { %v1475_v6 = vpop.f32.mrb[30].mxu1 }
 0x27f   :  { %v1476_v19 = vadd.f32 %v1595_v32, %v1475_v6  ;;  %v1787_v41 = vpop.f32.mrb[31].mxu1 }
 0x281   :  { %1480 = vst.msk [vmem:[#allocation3] sm:$0x3] %vm1479_vm5, %v1476_v19 }
 0x282   :  { %1826 = shalt.err (!%p1823_p4)
}
 0x283   :  { %s1827_s29 = scalar_lea.hbm %s2779_s9, 32 }
 0x284   :  { %p1828_p5 = scmp.ne.s32.totalorder %s2779_s9, %s1827_s29  ;;  %p1831_p6 = scmp.lt.u32.totalorder %s1827_s29, %s2779_s9 }
 0x286   :  { %p1833_p7 = pnand %p1831_p6, %p1828_p5 }
 0x288   :  { %1836 = shalt.err (!%p1833_p7)
}
 0x289   :  { %1518 = dma.vmem_to_hbm [thread:$0]  %s1516_s27, 32, %s2779_s9, [#allocation4]  }
 0x28a   :  { %1837 = dma.done.wait [#allocation4], 32  }
 0x28b   :  { %1838 = vsyncadd [#allocation4], 4294967264 }
 0x28c   :  { %1526 = vsyncpa [#allocation4], 1 }

</bundles_post_ra>
